<compile_context>
chip_gen: v7x
topology: tpu7x:2x2x1
jax: 0.10.0
libtpu: 0.0.40
codegen_flags: <defaults>
</compile_context>

<pallas_src>
import functools

import numpy as np
import jax
import jax.numpy as jnp
from jax.experimental import pallas as pl
from jax.experimental.pallas import tpu as pltpu


def _interp_matrix(n_in, n_out):
    """1-D linear interpolation matrix, PyTorch align_corners=True convention."""
    M = np.zeros((n_out, n_in), np.float32)
    if n_in == 1 or n_out == 1:
        M[:, 0] = 1.0
        return M
    scale = (n_in - 1) / (n_out - 1)
    for i in range(n_out):
        src = i * scale
        i0 = min(int(np.floor(src)), n_in - 1)
        i1 = min(i0 + 1, n_in - 1)
        f = src - i0
        M[i, i0] += 1.0 - f
        M[i, i1] += f
    return M


def build_upsample_matrix(Hl, Wl, Hh, Wh):
    """Single (Hl*Wl, Hh*Wh) bilinear-upsample (align_corners) matrix:
    K0[(H,W),(h,w)] = R[h,H] * C[w,W]."""
    R = _interp_matrix(Hl, Hh)    # (Hh, Hl)
    C = _interp_matrix(Wl, Wh)    # (Wh, Wl)
    return np.einsum('hH,wW->HWhw', R, C).reshape(Hl * Wl, Hh * Wh).astype(np.float32)


def build_border_masks(Hh, Wh):
    """(9, Hh*Wh) 0/1 masks: tap k=(dh+1)*3+(dw+1) is valid at flat position p
    iff the (dh,dw)-shifted source pixel lies inside the image (zero padding).
    Also kills the lane-roll wraparound positions (they are exactly the
    out-of-image ones)."""
    hw = Hh * Wh
    h = np.arange(hw) // Wh
    w = np.arange(hw) % Wh
    masks = np.zeros((9, hw), np.float32)
    k = 0
    for dh in (-1, 0, 1):
        for dc in (-1, 0, 1):
            valid = (h + dh >= 0) & (h + dh < Hh) & (w + dc >= 0) & (w + dc < Wh)
            masks[k] = valid.astype(np.float32)
            k += 1
    return masks


def ffm_kernel(lower_ref, higher_ref, k0_ref, mask_ref, cp_ref, w_ref, b_ref,
               out_ref, *, wh):
    x = lower_ref[0]                                    # (Cl, HWl)
    hwh = out_ref.shape[2]

    # Bilinear x4 upsample (align_corners=True): one MXU matmul against the
    # precomputed Kronecker interpolation matrix.
    up = jnp.dot(x, k0_ref[...], preferred_element_type=jnp.float32)   # (Cl, HWh)

    # Depthwise 3x3 (pad=1) on the upsampled slab: 8 static lane rotations
    # (XLU) + border masks, weighted by per-channel taps (BN scale prefolded).
    m_all = mask_ref[...]                               # (9, HWh) 0/1
    dw = cp_ref[4] * up                                 # center tap: no shift/mask
    k = 0
    for dh in (-1, 0, 1):
        for dc in (-1, 0, 1):
            if not (dh == 0 and dc == 0):
                s = dh * wh + dc                        # flat-index offset of the tap
                tap = pltpu.roll(up, (-s) % hwh, axis=1)    # tap[p] = up[p + s]
                dw = dw + (cp_ref[k] * m_all[k:k + 1, :]) * tap
            k += 1
    dw = jnp.maximum(dw + cp_ref[9], 0.0)               # folded dw-BN bias + ReLU

    # Both 1x1 convs (+ folded BN) merged into one MXU matmul over the
    # concatenated channel axis; branch add happens in the MXU K-accumulation.
    rhs = jnp.concatenate([dw, higher_ref[0]], axis=0)  # (Cl+Ch, HWh)
    out = jnp.dot(w_ref[...], rhs, preferred_element_type=jnp.float32)
    out_ref[0] = jnp.maximum(out + b_ref[...], 0.0).astype(out_ref.dtype)


def feature_fusion(lower, higher, K0, masks, cp, W_cat, b_out, Hh, Wh):
    """lower: (B,Cl,Hl,Wl)  higher: (B,Ch,Hh,Wh)  ->  (B,Cout,Hh,Wh)."""
    B, Cl, Hl, Wl = lower.shape
    _, Ch, _, _ = higher.shape
    Cout = W_cat.shape[0]
    HWl, HWh = Hl * Wl, Hh * Wh

    lower_s = lower.reshape(B, Cl, HWl)          # free lane-dense views
    higher_s = higher.reshape(B, Ch, HWh)

    kernel = functools.partial(ffm_kernel, wh=Wh)

    out = pl.pallas_call(
        kernel,
        out_shape=jax.ShapeDtypeStruct((B, Cout, HWh), jnp.float32),
        grid=(B,),
        in_specs=[
            pl.BlockSpec((1, Cl, HWl), lambda b: (b, 0, 0)),    # lower slab
            pl.BlockSpec((1, Ch, HWh), lambda b: (b, 0, 0)),    # higher slab
            pl.BlockSpec((HWl, HWh), lambda b: (0, 0)),         # upsample matrix
            pl.BlockSpec((9, HWh), lambda b: (0, 0)),           # 3x3 border masks
            pl.BlockSpec((10, Cl, 1), lambda b: (0, 0, 0)),     # taps*scale + bias
            pl.BlockSpec((Cout, Cl + Ch), lambda b: (0, 0)),    # [Wl_f | Wh_f]
            pl.BlockSpec((Cout, 1), lambda b: (0, 0)),          # combined bias
        ],
        out_specs=pl.BlockSpec((1, Cout, HWh), lambda b: (b, 0, 0)),
        compiler_params=pltpu.CompilerParams(
            dimension_semantics=("parallel",),                  # v7x: 2 TCs
            vmem_limit_bytes=32 * 1024 * 1024,
        ),
    )(lower_s, higher_s, K0, masks, cp, W_cat, b_out)
    return out.reshape(B, Cout, Hh, Wh)


def ref_forward(lower, higher, R, Cmat, dw_w, dw_s, dw_b, Wl_f, bl_f, Wh_f, bh_f):
    """Pure-JAX reference with the same folded BN parameters."""
    up = jnp.einsum('hH,wW,bcHW->bchw', R, Cmat, lower)
    B, Cl, Hh, Wh = up.shape
    pad = jnp.pad(up, ((0, 0), (0, 0), (1, 1), (1, 1)))
    dw = jnp.zeros_like(up)
    for dh in range(3):
        for dwi in range(3):
            dw = dw + pad[:, :, dh:dh + Hh, dwi:dwi + Wh] * dw_w[None, :, dh, dwi, None, None]
    dw = jnp.maximum(dw * dw_s[None, :, None, None] + dw_b[None, :, None, None], 0.0)
    low = jnp.einsum('oc,bchw->bohw', Wl_f, dw) + bl_f[None, :, None, None]
    hi = jnp.einsum('oc,bchw->bohw', Wh_f, higher) + bh_f[None, :, None, None]
    return jnp.maximum(low + hi, 0.0)


if __name__ == "__main__":
    # FeatureFusionModule(highter_in_channels=8, lower_in_channels=16, out_channels=16)
    B, Ch, Cl, Cout = 2, 8, 16, 16
    Hl = Wl = 8
    Hh, Wh = 4 * Hl, 4 * Wl
    eps = 1e-5

    keys = jax.random.split(jax.random.PRNGKey(0), 20)

    higher = jax.random.normal(keys[0], (B, Ch, Hh, Wh), jnp.float32)
    lower = jax.random.normal(keys[1], (B, Cl, Hl, Wl), jnp.float32)

    # _DWConv: depthwise 3x3 (groups=Cl, no bias) + BN + ReLU
    dw_weight = 0.2 * jax.random.normal(keys[2], (Cl, 3, 3), jnp.float32)
    g1 = 1.0 + 0.1 * jax.random.normal(keys[3], (Cl,), jnp.float32)
    b1 = 0.05 * jax.random.normal(keys[4], (Cl,), jnp.float32)
    m1 = 0.1 * jax.random.normal(keys[5], (Cl,), jnp.float32)
    v1 = 0.5 + jax.random.uniform(keys[6], (Cl,), jnp.float32)

    # conv_lower_res: 1x1 conv (bias) + BN
    w2 = 0.2 * jax.random.normal(keys[7], (Cout, Cout), jnp.float32)
    b2 = 0.05 * jax.random.normal(keys[8], (Cout,), jnp.float32)
    g2 = 1.0 + 0.1 * jax.random.normal(keys[9], (Cout,), jnp.float32)
    be2 = 0.05 * jax.random.normal(keys[10], (Cout,), jnp.float32)
    m2 = 0.1 * jax.random.normal(keys[11], (Cout,), jnp.float32)
    v2 = 0.5 + jax.random.uniform(keys[12], (Cout,), jnp.float32)

    # conv_higher_res: 1x1 conv (bias) + BN
    w3 = 0.2 * jax.random.normal(keys[13], (Cout, Ch), jnp.float32)
    b3 = 0.05 * jax.random.normal(keys[14], (Cout,), jnp.float32)
    g3 = 1.0 + 0.1 * jax.random.normal(keys[15], (Cout,), jnp.float32)
    be3 = 0.05 * jax.random.normal(keys[16], (Cout,), jnp.float32)
    m3 = 0.1 * jax.random.normal(keys[17], (Cout,), jnp.float32)
    v3 = 0.5 + jax.random.uniform(keys[18], (Cout,), jnp.float32)

    # Fold BatchNorm (inference / running stats) into scale+bias / weights.
    s1 = g1 / jnp.sqrt(v1 + eps)
    dw_s, dw_b = s1, b1 - m1 * s1
    s2 = g2 / jnp.sqrt(v2 + eps)
    Wl_f, bl_f = w2 * s2[:, None], s2 * (b2 - m2) + be2
    s3 = g3 / jnp.sqrt(v3 + eps)
    Wh_f, bh_f = w3 * s3[:, None], s3 * (b3 - m3) + be3

    # Geometry-only constants: one upsample matrix + the 9 stencil border masks.
    R = jnp.asarray(_interp_matrix(Hl, Hh))                   # (Hh, Hl)
    Cmat = jnp.asarray(_interp_matrix(Wl, Wh))                # (Wh, Wl)
    K0 = jnp.asarray(build_upsample_matrix(Hl, Wl, Hh, Wh))   # (HWl, HWh)
    masks = jnp.asarray(build_border_masks(Hh, Wh))           # (9, HWh)

    # Pack per-channel params: 9 tap weights with dw-BN scale folded in
    # (dh-major, dw-minor ordering) + the dw-BN bias, as one (10, Cl, 1) array.
    taps_folded = (dw_weight * dw_s[:, None, None]).reshape(Cl, 9)     # (Cl, 9)
    cp = jnp.concatenate([jnp.transpose(taps_folded), dw_b.reshape(1, Cl)],
                         axis=0).reshape(10, Cl, 1)
    # Merge the two 1x1 convs: concatenated weights + summed biases.
    W_cat = jnp.concatenate([Wl_f, Wh_f], axis=1)             # (Cout, Cl+Ch)
    b_out = (bl_f + bh_f).reshape(Cout, 1)

    out = feature_fusion(lower, higher, K0, masks, cp, W_cat, b_out, Hh, Wh)
    out = jax.block_until_ready(out)

    ref = ref_forward(lower, higher, R, Cmat, dw_weight, dw_s, dw_b,
                      Wl_f, bl_f, Wh_f, bh_f)
    err = float(jnp.max(jnp.abs(out - ref)))
    if err > 1e-3:
        raise AssertionError(f"kernel/reference mismatch: max abs err = {err}")
    print("KERNEL_OK")
</pallas_src>

<mosaic_0001>
module attributes {stable_mosaic.version = 11 : i64} {
  func.func @ffm_kernel(%arg0: i32, %arg1: memref<1x16x64xf32, #tpu.memory_space<vmem>>, %arg2: memref<1x8x1024xf32, #tpu.memory_space<vmem>>, %arg3: memref<64x1024xf32, #tpu.memory_space<vmem>>, %arg4: memref<9x1024xf32, #tpu.memory_space<vmem>>, %arg5: memref<10x16x1xf32, #tpu.memory_space<vmem>>, %arg6: memref<16x24xf32, #tpu.memory_space<vmem>>, %arg7: memref<16x1xf32, #tpu.memory_space<vmem>>, %arg8: memref<1x16x1024xf32, #tpu.memory_space<vmem>>) attributes {dimension_semantics = [#tpu.dimension_semantics<parallel>], iteration_bounds = array<i64: 2>, scalar_prefetch = 0 : i64, scratch_operands = 0 : i64, tpu.core_type = #tpu.core_type<tc>, window_params = [{transform_indices = @transform_0, window_bounds = array<i64: 1, 16, 64>}, {transform_indices = @transform_1, window_bounds = array<i64: 1, 8, 1024>}, {pipeline_mode = #tpu.pipeline_mode<synchronous>, transform_indices = @transform_2, window_bounds = array<i64: 64, 1024>}, {pipeline_mode = #tpu.pipeline_mode<synchronous>, transform_indices = @transform_3, window_bounds = array<i64: 9, 1024>}, {pipeline_mode = #tpu.pipeline_mode<synchronous>, transform_indices = @transform_4, window_bounds = array<i64: 10, 16, 1>}, {pipeline_mode = #tpu.pipeline_mode<synchronous>, transform_indices = @transform_5, window_bounds = array<i64: 16, 24>}, {pipeline_mode = #tpu.pipeline_mode<synchronous>, transform_indices = @transform_6, window_bounds = array<i64: 16, 1>}, {transform_indices = @transform_7, window_bounds = array<i64: 1, 16, 1024>}]} {
    %c0 = arith.constant 0 : index
    %c0_0 = arith.constant 0 : index
    %c0_1 = arith.constant 0 : index
    %0 = vector.load %arg1[%c0, %c0_0, %c0_1] : memref<1x16x64xf32, #tpu.memory_space<vmem>>, vector<1x16x64xf32>
    %1 = vector.shape_cast %0 : vector<1x16x64xf32> to vector<16x64xf32>
    %c0_2 = arith.constant 0 : index
    %c0_3 = arith.constant 0 : index
    %2 = vector.load %arg3[%c0_2, %c0_3] : memref<64x1024xf32, #tpu.memory_space<vmem>>, vector<64x1024xf32>
    %cst = arith.constant dense<0.000000e+00> : vector<16x1024xf32>
    %3 = tpu.matmul %1, %2, %cst {dimension_numbers = #tpu.dot_dimension_numbers<[1], [0], [0], [1], [0, 0, 1, 1], [], []>} : vector<16x64xf32>, vector<64x1024xf32>, vector<16x1024xf32> -> vector<16x1024xf32>
    %c0_4 = arith.constant 0 : index
    %c0_5 = arith.constant 0 : index
    %4 = vector.load %arg4[%c0_4, %c0_5] : memref<9x1024xf32, #tpu.memory_space<vmem>>, vector<9x1024xf32>
    %c4 = arith.constant 4 : index
    %c0_6 = arith.constant 0 : index
    %c0_7 = arith.constant 0 : index
    %5 = vector.load %arg5[%c4, %c0_6, %c0_7] : memref<10x16x1xf32, #tpu.memory_space<vmem>>, vector<1x16x1xf32>
    %6 = vector.shape_cast %5 : vector<1x16x1xf32> to vector<16x1xf32>
    %7 = vector.broadcast %6 : vector<16x1xf32> to vector<16x1024xf32>
    %8 = arith.mulf %7, %3 : vector<16x1024xf32>
    %c33_i32 = arith.constant 33 : i32
    %9 = tpu.dynamic_rotate %3 by %c33_i32 dim 1 : vector<16x1024xf32>, i32 -> vector<16x1024xf32>
    %c0_8 = arith.constant 0 : index
    %c0_9 = arith.constant 0 : index
    %c0_10 = arith.constant 0 : index
    %10 = vector.load %arg5[%c0_8, %c0_9, %c0_10] : memref<10x16x1xf32, #tpu.memory_space<vmem>>, vector<1x16x1xf32>
    %11 = vector.shape_cast %10 : vector<1x16x1xf32> to vector<16x1xf32>
    %12 = vector.extract_strided_slice %4 {offsets = [0, 0], sizes = [1, 1024], strides = [1, 1]} : vector<9x1024xf32> to vector<1x1024xf32>
    %13 = vector.broadcast %11 : vector<16x1xf32> to vector<16x1024xf32>
    %14 = vector.broadcast %12 : vector<1x1024xf32> to vector<16x1024xf32>
    %15 = arith.mulf %13, %14 : vector<16x1024xf32>
    %16 = arith.mulf %15, %9 : vector<16x1024xf32>
    %17 = arith.addf %8, %16 : vector<16x1024xf32>
    %c32_i32 = arith.constant 32 : i32
    %18 = tpu.dynamic_rotate %3 by %c32_i32 dim 1 : vector<16x1024xf32>, i32 -> vector<16x1024xf32>
    %c1 = arith.constant 1 : index
    %c0_11 = arith.constant 0 : index
    %c0_12 = arith.constant 0 : index
    %19 = vector.load %arg5[%c1, %c0_11, %c0_12] : memref<10x16x1xf32, #tpu.memory_space<vmem>>, vector<1x16x1xf32>
    %20 = vector.shape_cast %19 : vector<1x16x1xf32> to vector<16x1xf32>
    %21 = vector.extract_strided_slice %4 {offsets = [1, 0], sizes = [1, 1024], strides = [1, 1]} : vector<9x1024xf32> to vector<1x1024xf32>
    %22 = vector.broadcast %20 : vector<16x1xf32> to vector<16x1024xf32>
    %23 = vector.broadcast %21 : vector<1x1024xf32> to vector<16x1024xf32>
    %24 = arith.mulf %22, %23 : vector<16x1024xf32>
    %25 = arith.mulf %24, %18 : vector<16x1024xf32>
    %26 = arith.addf %17, %25 : vector<16x1024xf32>
    %c31_i32 = arith.constant 31 : i32
    %27 = tpu.dynamic_rotate %3 by %c31_i32 dim 1 : vector<16x1024xf32>, i32 -> vector<16x1024xf32>
    %c2 = arith.constant 2 : index
    %c0_13 = arith.constant 0 : index
    %c0_14 = arith.constant 0 : index
    %28 = vector.load %arg5[%c2, %c0_13, %c0_14] : memref<10x16x1xf32, #tpu.memory_space<vmem>>, vector<1x16x1xf32>
    %29 = vector.shape_cast %28 : vector<1x16x1xf32> to vector<16x1xf32>
    %30 = vector.extract_strided_slice %4 {offsets = [2, 0], sizes = [1, 1024], strides = [1, 1]} : vector<9x1024xf32> to vector<1x1024xf32>
    %31 = vector.broadcast %29 : vector<16x1xf32> to vector<16x1024xf32>
    %32 = vector.broadcast %30 : vector<1x1024xf32> to vector<16x1024xf32>
    %33 = arith.mulf %31, %32 : vector<16x1024xf32>
    %34 = arith.mulf %33, %27 : vector<16x1024xf32>
    %35 = arith.addf %26, %34 : vector<16x1024xf32>
    %c1_i32 = arith.constant 1 : i32
    %36 = tpu.dynamic_rotate %3 by %c1_i32 dim 1 : vector<16x1024xf32>, i32 -> vector<16x1024xf32>
    %c3 = arith.constant 3 : index
    %c0_15 = arith.constant 0 : index
    %c0_16 = arith.constant 0 : index
    %37 = vector.load %arg5[%c3, %c0_15, %c0_16] : memref<10x16x1xf32, #tpu.memory_space<vmem>>, vector<1x16x1xf32>
    %38 = vector.shape_cast %37 : vector<1x16x1xf32> to vector<16x1xf32>
    %39 = vector.extract_strided_slice %4 {offsets = [3, 0], sizes = [1, 1024], strides = [1, 1]} : vector<9x1024xf32> to vector<1x1024xf32>
    %40 = vector.broadcast %38 : vector<16x1xf32> to vector<16x1024xf32>
    %41 = vector.broadcast %39 : vector<1x1024xf32> to vector<16x1024xf32>
    %42 = arith.mulf %40, %41 : vector<16x1024xf32>
    %43 = arith.mulf %42, %36 : vector<16x1024xf32>
    %44 = arith.addf %35, %43 : vector<16x1024xf32>
    %c1023_i32 = arith.constant 1023 : i32
    %45 = tpu.dynamic_rotate %3 by %c1023_i32 dim 1 : vector<16x1024xf32>, i32 -> vector<16x1024xf32>
    %c5 = arith.constant 5 : index
    %c0_17 = arith.constant 0 : index
    %c0_18 = arith.constant 0 : index
    %46 = vector.load %arg5[%c5, %c0_17, %c0_18] : memref<10x16x1xf32, #tpu.memory_space<vmem>>, vector<1x16x1xf32>
    %47 = vector.shape_cast %46 : vector<1x16x1xf32> to vector<16x1xf32>
    %48 = vector.extract_strided_slice %4 {offsets = [5, 0], sizes = [1, 1024], strides = [1, 1]} : vector<9x1024xf32> to vector<1x1024xf32>
    %49 = vector.broadcast %47 : vector<16x1xf32> to vector<16x1024xf32>
    %50 = vector.broadcast %48 : vector<1x1024xf32> to vector<16x1024xf32>
    %51 = arith.mulf %49, %50 : vector<16x1024xf32>
    %52 = arith.mulf %51, %45 : vector<16x1024xf32>
    %53 = arith.addf %44, %52 : vector<16x1024xf32>
    %c993_i32 = arith.constant 993 : i32
    %54 = tpu.dynamic_rotate %3 by %c993_i32 dim 1 : vector<16x1024xf32>, i32 -> vector<16x1024xf32>
    %c6 = arith.constant 6 : index
    %c0_19 = arith.constant 0 : index
    %c0_20 = arith.constant 0 : index
    %55 = vector.load %arg5[%c6, %c0_19, %c0_20] : memref<10x16x1xf32, #tpu.memory_space<vmem>>, vector<1x16x1xf32>
    %56 = vector.shape_cast %55 : vector<1x16x1xf32> to vector<16x1xf32>
    %57 = vector.extract_strided_slice %4 {offsets = [6, 0], sizes = [1, 1024], strides = [1, 1]} : vector<9x1024xf32> to vector<1x1024xf32>
    %58 = vector.broadcast %56 : vector<16x1xf32> to vector<16x1024xf32>
    %59 = vector.broadcast %57 : vector<1x1024xf32> to vector<16x1024xf32>
    %60 = arith.mulf %58, %59 : vector<16x1024xf32>
    %61 = arith.mulf %60, %54 : vector<16x1024xf32>
    %62 = arith.addf %53, %61 : vector<16x1024xf32>
    %c992_i32 = arith.constant 992 : i32
    %63 = tpu.dynamic_rotate %3 by %c992_i32 dim 1 : vector<16x1024xf32>, i32 -> vector<16x1024xf32>
    %c7 = arith.constant 7 : index
    %c0_21 = arith.constant 0 : index
    %c0_22 = arith.constant 0 : index
    %64 = vector.load %arg5[%c7, %c0_21, %c0_22] : memref<10x16x1xf32, #tpu.memory_space<vmem>>, vector<1x16x1xf32>
    %65 = vector.shape_cast %64 : vector<1x16x1xf32> to vector<16x1xf32>
    %66 = vector.extract_strided_slice %4 {offsets = [7, 0], sizes = [1, 1024], strides = [1, 1]} : vector<9x1024xf32> to vector<1x1024xf32>
    %67 = vector.broadcast %65 : vector<16x1xf32> to vector<16x1024xf32>
    %68 = vector.broadcast %66 : vector<1x1024xf32> to vector<16x1024xf32>
    %69 = arith.mulf %67, %68 : vector<16x1024xf32>
    %70 = arith.mulf %69, %63 : vector<16x1024xf32>
    %71 = arith.addf %62, %70 : vector<16x1024xf32>
    %c991_i32 = arith.constant 991 : i32
    %72 = tpu.dynamic_rotate %3 by %c991_i32 dim 1 : vector<16x1024xf32>, i32 -> vector<16x1024xf32>
    %c8 = arith.constant 8 : index
    %c0_23 = arith.constant 0 : index
    %c0_24 = arith.constant 0 : index
    %73 = vector.load %arg5[%c8, %c0_23, %c0_24] : memref<10x16x1xf32, #tpu.memory_space<vmem>>, vector<1x16x1xf32>
    %74 = vector.shape_cast %73 : vector<1x16x1xf32> to vector<16x1xf32>
    %75 = vector.extract_strided_slice %4 {offsets = [8, 0], sizes = [1, 1024], strides = [1, 1]} : vector<9x1024xf32> to vector<1x1024xf32>
    %76 = vector.broadcast %74 : vector<16x1xf32> to vector<16x1024xf32>
    %77 = vector.broadcast %75 : vector<1x1024xf32> to vector<16x1024xf32>
    %78 = arith.mulf %76, %77 : vector<16x1024xf32>
    %79 = arith.mulf %78, %72 : vector<16x1024xf32>
    %80 = arith.addf %71, %79 : vector<16x1024xf32>
    %c9 = arith.constant 9 : index
    %c0_25 = arith.constant 0 : index
    %c0_26 = arith.constant 0 : index
    %81 = vector.load %arg5[%c9, %c0_25, %c0_26] : memref<10x16x1xf32, #tpu.memory_space<vmem>>, vector<1x16x1xf32>
    %82 = vector.shape_cast %81 : vector<1x16x1xf32> to vector<16x1xf32>
    %83 = vector.broadcast %82 : vector<16x1xf32> to vector<16x1024xf32>
    %84 = arith.addf %80, %83 : vector<16x1024xf32>
    %cst_27 = arith.constant 0.000000e+00 : f32
    %85 = vector.broadcast %cst_27 : f32 to vector<16x1024xf32>
    %86 = arith.maximumf %84, %85 : vector<16x1024xf32>
    %c0_28 = arith.constant 0 : index
    %c0_29 = arith.constant 0 : index
    %c0_30 = arith.constant 0 : index
    %87 = vector.load %arg2[%c0_28, %c0_29, %c0_30] : memref<1x8x1024xf32, #tpu.memory_space<vmem>>, vector<1x8x1024xf32>
    %88 = vector.shape_cast %87 : vector<1x8x1024xf32> to vector<8x1024xf32>
    %89 = tpu.concatenate %86, %88 in 0 : vector<16x1024xf32>, vector<8x1024xf32> -> vector<24x1024xf32>
    %c0_31 = arith.constant 0 : index
    %c0_32 = arith.constant 0 : index
    %90 = vector.load %arg6[%c0_31, %c0_32] : memref<16x24xf32, #tpu.memory_space<vmem>>, vector<16x24xf32>
    %cst_33 = arith.constant dense<0.000000e+00> : vector<16x1024xf32>
    %91 = tpu.matmul %90, %89, %cst_33 {dimension_numbers = #tpu.dot_dimension_numbers<[1], [0], [0], [1], [0, 0, 1, 1], [], []>} : vector<16x24xf32>, vector<24x1024xf32>, vector<16x1024xf32> -> vector<16x1024xf32>
    %c0_34 = arith.constant 0 : index
    %c0_35 = arith.constant 0 : index
    %92 = vector.load %arg7[%c0_34, %c0_35] : memref<16x1xf32, #tpu.memory_space<vmem>>, vector<16x1xf32>
    %93 = vector.broadcast %92 : vector<16x1xf32> to vector<16x1024xf32>
    %94 = arith.addf %91, %93 : vector<16x1024xf32>
    %cst_36 = arith.constant 0.000000e+00 : f32
    %95 = vector.broadcast %cst_36 : f32 to vector<16x1024xf32>
    %96 = arith.maximumf %94, %95 : vector<16x1024xf32>
    %c0_37 = arith.constant 0 : index
    %c0_38 = arith.constant 0 : index
    %c0_39 = arith.constant 0 : index
    %97 = vector.load %arg8[%c0_37, %c0_38, %c0_39] : memref<1x16x1024xf32, #tpu.memory_space<vmem>>, vector<1x16x1024xf32>
    %98 = vector.shape_cast %97 : vector<1x16x1024xf32> to vector<16x1024xf32>
    %99 = vector.shape_cast %96 : vector<16x1024xf32> to vector<1x16x1024xf32>
    tpu.vector_store %arg8[%c0_37, %c0_38, %c0_39], %99 {strides = array<i32>} : memref<1x16x1024xf32, #tpu.memory_space<vmem>>, vector<1x16x1024xf32>,
    return
  }
  func.func @transform_0(%arg0: i32) -> (i32, i32, i32) {
    %c0_i32 = arith.constant 0 : i32
    %c0_i32_0 = arith.constant 0 : i32
    %c0_i32_1 = arith.constant 0 : i32
    return %arg0, %c0_i32, %c0_i32_0 : i32, i32, i32
  }
  func.func @transform_1(%arg0: i32) -> (i32, i32, i32) {
    %c0_i32 = arith.constant 0 : i32
    %c0_i32_0 = arith.constant 0 : i32
    %c0_i32_1 = arith.constant 0 : i32
    return %arg0, %c0_i32, %c0_i32_0 : i32, i32, i32
  }
  func.func @transform_2(%arg0: i32) -> (i32, i32) {
    %c0_i32 = arith.constant 0 : i32
    %c0_i32_0 = arith.constant 0 : i32
    %c0_i32_1 = arith.constant 0 : i32
    return %c0_i32, %c0_i32_0 : i32, i32
  }
  func.func @transform_3(%arg0: i32) -> (i32, i32) {
    %c0_i32 = arith.constant 0 : i32
    %c0_i32_0 = arith.constant 0 : i32
    %c0_i32_1 = arith.constant 0 : i32
    return %c0_i32, %c0_i32_0 : i32, i32
  }
  func.func @transform_4(%arg0: i32) -> (i32, i32, i32) {
    %c0_i32 = arith.constant 0 : i32
    %c0_i32_0 = arith.constant 0 : i32
    %c0_i32_1 = arith.constant 0 : i32
    %c0_i32_2 = arith.constant 0 : i32
    return %c0_i32, %c0_i32_0, %c0_i32_1 : i32, i32, i32
  }
  func.func @transform_5(%arg0: i32) -> (i32, i32) {
    %c0_i32 = arith.constant 0 : i32
    %c0_i32_0 = arith.constant 0 : i32
    %c0_i32_1 = arith.constant 0 : i32
    return %c0_i32, %c0_i32_0 : i32, i32
  }
  func.func @transform_6(%arg0: i32) -> (i32, i32) {
    %c0_i32 = arith.constant 0 : i32
    %c0_i32_0 = arith.constant 0 : i32
    %c0_i32_1 = arith.constant 0 : i32
    return %c0_i32, %c0_i32_0 : i32, i32
  }
  func.func @transform_7(%arg0: i32) -> (i32, i32, i32) {
    %c0_i32 = arith.constant 0 : i32
    %c0_i32_0 = arith.constant 0 : i32
    %c0_i32_1 = arith.constant 0 : i32
    return %arg0, %c0_i32, %c0_i32_0 : i32, i32, i32
  }
}

</mosaic_0001>

<bundles_post_ra>
// kernel: tpu_custom_call.1
= control target key start
LH: loop header
LB: loop body
LE: loop exit
PB: predicated region body
PF: predicated region fallthrough
CT: control target
= control target key end

     0   :  { %12 = vsyncpa [#allocation3], 0  ;;  %s4664_s0 = inlined_call_operand.vmem [shape: f32[2,16,64], index: 0, kind: input, shape index: {}]   ;;  %s4665_s1 = inlined_call_operand.vmem [shape: f32[2,8,1024], index: 1, kind: input, shape index: {}]   ;;  %s4666_s2 = inlined_call_operand.hbm [shape: f32[64,1024], index: 2, kind: input, shape index: {}]   ;;  %s4667_s3 = inlined_call_operand.hbm [shape: f32[9,1024], index: 3, kind: input, shape index: {}]   ;;  %s4668_s4 = inlined_call_operand.vmem [shape: f32[10,16,1], index: 4, kind: input, shape index: {}]   ;;  %s4669_s5 = inlined_call_operand.vmem [shape: f32[16,24], index: 5, kind: input, shape index: {}]   ;;  %s4670_s6 = inlined_call_operand.vmem [shape: f32[16,1], index: 6, kind: input, shape index: {}]   ;;  %s4671_s7 = inlined_call_operand.hbm [shape: f32[2,16,1024], index: 7, kind: output, shape index: {}]  }
   0x1   :  { %13 = vsyncpa [#allocation6], 0 }
   0x2   :  { %14 = vsyncpa [#allocation4], 0 }
   0x3   :  { %16 = vsyncpa [#allocation4 + $0x1], 0  ;;  %s2818_s24 = smov 0   ;;  %s2820_s25 = smov 0  }
   0x4   :  { %s2822_s26 = smov 0   ;;  %s2824_s27 = smov 0  }
   0x5 LB: > { %s2839_s28 = sadd.s32 4294967295, %s2759_s27   ;;  %s2414_s29 = sadd.s32 4294967294, %s2759_s27   ;;  %s2759_s27 = sphi %s2824_s27, %s5072_s27   ;;  %s2755_s26 = sphi %s2822_s26, %s5071_s26   ;;  %s2751_s25 = sphi %s2820_s25, %s5070_s25   ;;  %s2747_s24 = sphi %s2818_s24, %s5069_s24  }
   0x6   : > { %s2843_s30 = sadd.s32 1, %s2759_s27   ;;  %s186_s8 = sadd.s32 1, %s2755_s26 }
   0x7   : > { %s183_s9 = ssub.s32 %s2759_s27, %s2843_s30  ;;  %p196_p0 = scmp.ne.s32.totalorder %s2755_s26, %s2751_s25 }
   0x8   : > { %p184_p1 = scmp.eq.s32.totalorder %s183_s9, 0  ;;  %p197_p2 = scmp.eq.s32.totalorder %s2839_s28, 1 }
   0x9   : > { %p202_p3 = scmp.ne.s32.totalorder %s2751_s25, %s2747_s24  ;;  %p203_p4 = scmp.eq.s32.totalorder %s2414_s29, 1 }
   0xa   : > { %s2854_s10 = scalar_select %p184_p1, %s2755_s26, %s186_s8  }
   0xb   : > { %p2856_p5 = por %p197_p2, %p196_p0  ;;  %p2860_p6 = por %p203_p4, %p202_p3 }
   0xc   : > { %4805 = sst [smem:[#allocation11_spill]] %s2854_s10  ;;  %p2415_p7 = scmp.ge.s32.totalorder %s2759_s27, 1 }
   0xd   : > { %s4806_s11 = scalar_select %p2856_p5, 1, 0 }
   0xe   : > { %s4807_s12 = scalar_select %p2860_p6, 1, 0 }
   0xf   : > { %p210_p8 = scmp.lt.s32.totalorder %s2759_s27, 3  ;;  %p4672_p9 = scmp.eq.s32.totalorder %s2839_s28, 0 }
  0x10   : > { %s2761_s14 = smov [#allocation2]   ;;  %s2762_s17 = smov [#allocation5]  }
  0x11   : > { %p2867_p10 = pnand %p2415_p7, %p210_p8  ;;  %s222_s15 = sshll.u32 %s2761_s14, 4  ;;  %s223_s15 = int_to_ptr.vmem [resolvable:$true] %s222_s15 }
  0x12   : > { %s235_s18 = sshll.u32 %s2762_s17, 4  ;;  %s2633_s21 = scalar_lea.hbm %s4666_s2, 8192  ;;  %s2879_s18 = int_to_ptr.vmem [resolvable:$true] %s235_s18 }
  0x13   : > { %s4808_s13 = scalar_select %p2867_p10, 1, 0 }
  0x14   : > { %p2567_p11 = pneg %p2867_p10  ;;  %p2634_p13 = scmp.ne.s32.totalorder %s4666_s2, %s2633_s21 }
  0x15   : > { %p2640_p3 = scmp.lt.u32.totalorder %s2633_s21, %s4666_s2 }
  0x16   : > { %p2875_p12 = pnand %p4672_p9, %p2567_p11 }
  0x18   : > { %p2635_p0 = pneg %p2875_p12 }
  0x1a   : > { %p2636_p1 = pnand %p2635_p0, %p2634_p13 }
  0x1c   : > { %p2637_p2 = pneg %p2636_p1 }
  0x1e   : > { %p2642_p4 = pnand %p2640_p3, %p2637_p2 }
  0x20   : > { %2645 = shalt.err (!%p2642_p4)
}
  0x21   : > { %s2646_s9 = scalar_lea.vmem %s223_s15, 8192  ;;  %p2654_p9 = scmp.lt.s32.totalorder %s223_s15, %s223_s15 }
  0x22   : > { %p2647_p7 = scmp.ne.s32.totalorder %s223_s15, %s2646_s9  ;;  %p2655_p6 = scmp.lt.s32.totalorder %s2646_s9, %s2646_s9 }
  0x24   : > { %p2649_p8 = pnand %p2647_p7, %p2635_p0  ;;  %p2656_p5 = por %p2655_p6, %p2654_p9 }
  0x26   : > { %p2650_p11 = pneg %p2649_p8 }
  0x28   : > { %p2657_p10 = pnand %p2656_p5, %p2650_p11 }
  0x2a   : > { %2660 = shalt.err (!%p2657_p10)
}
  0x2b   : > { %s2763_s14 = smov 1024   ;;  %s2764_s17 = smov 64  }
  0x2c   : > { %2570 = dma.hbm_to_vmem [thread:$0]  (!%p2875_p12), %s4666_s2, 8192, %s223_s15, [#allocation3], %s2763_s14, %s2763_s14, %s2764_s17  }
  0x2d   : > { %s2661_s23 = scalar_lea.hbm %s4667_s3, 2048 }
  0x2e   : > { %p2662_p13 = scmp.ne.s32.totalorder %s4667_s3, %s2661_s23  ;;  %p2668_p9 = scmp.lt.u32.totalorder %s2661_s23, %s4667_s3 }
  0x30   : > { %p2664_p5 = pnand %p2662_p13, %p2635_p0 }
  0x32   : > { %p2665_p6 = pneg %p2664_p5 }
  0x34   : > { %p2670_p10 = pnand %p2668_p9, %p2665_p6 }
  0x36   : > { %2673 = shalt.err (!%p2670_p10)
}
  0x37   : > { %s2674_s15 = scalar_lea.vmem %s2879_s18, 2048  ;;  %p2682_p4 = scmp.lt.s32.totalorder %s2879_s18, %s2879_s18 }
  0x38   : > { %p2675_p1 = scmp.ne.s32.totalorder %s2879_s18, %s2674_s15  ;;  %p2683_p7 = scmp.lt.s32.totalorder %s2674_s15, %s2674_s15 }
  0x3a   : > { %p2677_p2 = pnand %p2675_p1, %p2635_p0  ;;  %p2684_p8 = por %p2683_p7, %p2682_p4 }
  0x3c   : > { %p2678_p3 = pneg %p2677_p2 }
  0x3e   : > { %p2685_p11 = pnand %p2684_p8, %p2678_p3 }
  0x40   : > { %2688 = shalt.err (!%p2685_p11)
}
  0x41   : > { %2573 = dma.hbm_to_vmem [thread:$0]  (!%p2875_p12), %s4667_s3, 2048, %s2879_s18, [#allocation6], %s2763_s14, %s2763_s14, %s2764_s17  }
  0x42   : > { %p4810_p13 = scmp.ne.s32.totalorder %s4808_s13, 0 }
  0x44   : > { %276 = sbr.rel (%p4810_p13) target bundleno = 938 (0x3aa), region = 48 }
  0x4b   : > { %p4811_p5 = scmp.eq.s32.totalorder %s2839_s28, 0 }
  0x4d   : > { %2734 = dma.done.wait (%p4811_p5), [#allocation3], 8192   ;;  %p4812_p0 = pmov %p4811_p5 }
  0x4f   : > { %2736 = vsyncadd (%p4812_p0), [#allocation3], 4294959104  ;;  %p4813_p6 = pmov %p4812_p0 }
  0x50   : > { %p4814_p9 = pmov %p4812_p0 }
  0x51   : > { %2738 = dma.done.wait (%p4813_p6), [#allocation6], 2048  }
  0x52   : > { %2740 = vsyncadd (%p4814_p9), [#allocation6], 4294965248  ;;  %v4675_v0 = vmov 0.0   ;;  %v2766_v1 = vmov 0   ;;  %v330_v2 = vld [vmem:[#allocation2 + $0x8] sm:$0xff]  ;;  %v332_v4 = vld [vmem:[#allocation2 + $0x18] sm:$0xff] }
  0x53   : > { %464 = vmatprep.mubr.f32.mxu0 %v4675_v0  ;;  %541 = vmatprep.mubr.f32.mxu1 %v4675_v0  ;;  %v338_v3 = vld [vmem:[#allocation2 + $0x48] sm:$0xff]  ;;  %v340_v6 = vld [vmem:[#allocation2 + $0x58] sm:$0xff]  ;;  %v329_v7 = vld [vmem:[#allocation2] sm:$0xff]  ;;  %p317_p12 = scmp.lt.s32.totalorder %s2839_s28, 1  ;;  %vm393_vm0 = vcmask 523264   ;;  %s2767_s14 = smov 33  }
  0x54   : > { %2631 = vset.pattern.permute.xlu0 %v2766_v1  ;;  %2632 = vset.pattern.permute.xlu1 %v2766_v1  ;;  %v2477_v5 = vpack.c.bf16 %v338_v3, %v330_v2  ;;  %v337_v8 = vld [vmem:[#allocation2 + $0x40] sm:$0xff]  ;;  %v2493_v9 = vpack.c.bf16 %v340_v6, %v332_v4  ;;  %v331_v11 = vld [vmem:[#allocation2 + $0x10] sm:$0xff]  ;;  %v346_v13 = vld [vmem:[#allocation2 + $0x88] sm:$0xff]  ;;  %s2769_s20 = smov 31   ;;  %s2770_s21 = smov 1   ;;  %vm1957_vm9 = vcmask 195584  }
  0x55   : > { %v2479_v10 = vpack.c.bf16 %v337_v8, %v329_v7  ;;  %v339_v12 = vld [vmem:[#allocation2 + $0x50] sm:$0xff]  ;;  %v354_v15 = vld [vmem:[#allocation2 + $0xc8] sm:$0xff]  ;;  %v348_v16 = vld [vmem:[#allocation2 + $0x98] sm:$0xff]  ;;  %s2944_s13 = scalar_select %p317_p12, %s2839_s28, 1 }
  0x56   : > { %2478 = vmatprep.subr.bf16.mxu0 %v2477_v5  ;;  %v2495_v14 = vpack.c.bf16 %v339_v12, %v331_v11  ;;  %v356_v17 = vld [vmem:[#allocation2 + $0xd8] sm:$0xff]  ;;  %2494 = vmatprep.subr.bf16.mxu1 %v2493_v9  ;;  %v2481_v18 = vpack.c.bf16 %v354_v15, %v346_v13  ;;  %v345_v20 = vld [vmem:[#allocation2 + $0x80] sm:$0xff]  ;;  %v347_v22 = vld [vmem:[#allocation2 + $0x90] sm:$0xff]  ;;  %s2771_s22 = smov 127   ;;  %s2772_s23 = smov 97  }
  0x57   : > { %2480 = vmatpush1.bf16.msra.mxu0 %v2479_v10  ;;  %v2497_v19 = vpack.c.bf16 %v356_v17, %v348_v16  ;;  %v353_v21 = vld [vmem:[#allocation2 + $0xc0] sm:$0xff]  ;;  %v355_v24 = vld [vmem:[#allocation2 + $0xd0] sm:$0xff]  ;;  %v362_v25 = vld [vmem:[#allocation2 + $0x108] sm:$0xff]  ;;  %s2474_s16 = sshll.u32 %s2944_s13, 4  ;;  %s2773_s29 = smov 96  }
  0x58   : > { %2496 = vmatpush1.bf16.msra.mxu1 %v2495_v14  ;;  %v2483_v23 = vpack.c.bf16 %v353_v21, %v345_v20  ;;  %v370_v26 = vld [vmem:[#allocation2 + $0x148] sm:$0xff]  ;;  %2482 = vmatprep.subr.bf16.mxu0 %v2481_v18  ;;  %v2499_v27 = vpack.c.bf16 %v355_v24, %v347_v22  ;;  %v364_v29 = vld [vmem:[#allocation2 + $0x118] sm:$0xff]  ;;  %v361_v31 = vld [vmem:[#allocation2 + $0x100] sm:$0xff]  ;;  %s2950_s17 = scalar_lea.vmem %s4664_s0, %s2474_s16  ;;  %s2774_s8 = smov 95  }
  0x59   : > { %2498 = vmatprep.subr.bf16.mxu1 %v2497_v19  ;;  %v2485_v28 = vpack.c.bf16 %v370_v26, %v362_v25  ;;  %v372_v30 = vld [vmem:[#allocation2 + $0x158] sm:$0xff]  ;;  %v369_v33 = vld [vmem:[#allocation2 + $0x140] sm:$0xff]  ;;  %v363_v34 = vld [vmem:[#allocation2 + $0x110] sm:$0xff]  ;;  %s2475_s16 = sshll.u32 %s2944_s13, 6  ;;  %s2476_s9 = sshll.u32 %s2839_s28, 11 }
  0x5a   : > { %v2501_v32 = vpack.c.bf16 %v372_v30, %v364_v29  ;;  %v371_v35 = vld [vmem:[#allocation2 + $0x150] sm:$0xff]  ;;  %v2487_v36 = vpack.c.bf16 %v369_v33, %v361_v31  ;;  %v378_v37 = vld [vmem:[#allocation2 + $0x188] sm:$0xff]  ;;  %v380_v39 = vld [vmem:[#allocation2 + $0x198] sm:$0xff]  ;;  %p5066_p1 = scmp.ne.s32.totalorder %s4806_s11, 0  ;;  %s2775_s18 = smov [#allocation7]  }
  0x5b   : > { %2484 = vmatpush1.bf16.msra.mxu0 %v2483_v23  ;;  %v386_v38 = vld [vmem:[#allocation2 + $0x1c8] sm:$0xff]  ;;  %v2503_v40 = vpack.c.bf16 %v371_v35, %v363_v34  ;;  %v388_v42 = vld [vmem:[#allocation2 + $0x1d8] sm:$0xff]  ;;  %v377_v43 = vld [vmem:[#allocation2 + $0x180] sm:$0xff] }
  0x5c   : > { %2500 = vmatpush1.bf16.msra.mxu1 %v2499_v27  ;;  %2486 = vmatprep.subr.bf16.mxu0 %v2485_v28  ;;  %v2489_v41 = vpack.c.bf16 %v386_v38, %v378_v37  ;;  %v385_v44 = vld [vmem:[#allocation2 + $0x1c0] sm:$0xff]  ;;  %v2505_v45 = vpack.c.bf16 %v388_v42, %v380_v39  ;;  %v379_v46 = vld [vmem:[#allocation2 + $0x190] sm:$0xff]  ;;  %v334_v48 = vld [vmem:[#allocation2 + $0x28] sm:$0xff] }
  0x5d   : > { %2502 = vmatprep.subr.bf16.mxu1 %v2501_v32  ;;  %v387_v47 = vld [vmem:[#allocation2 + $0x1d0] sm:$0xff]  ;;  %v342_v49 = vld [vmem:[#allocation2 + $0x68] sm:$0xff]  ;;  %v2491_v50 = vpack.c.bf16 %v385_v44, %v377_v43  ;;  %v336_v51 = vld [vmem:[#allocation2 + $0x38] sm:$0xff] }
  0x5e   : > { %v344_v52 = vld [vmem:[#allocation2 + $0x78] sm:$0xff]  ;;  %v2507_v53 = vpack.c.bf16 %v387_v47, %v379_v46  ;;  %v2509_v54 = vpack.c.bf16 %v342_v49, %v334_v48  ;;  %v333_v56 = vld [vmem:[#allocation2 + $0x20] sm:$0xff]  ;;  %v335_v58 = vld [vmem:[#allocation2 + $0x30] sm:$0xff] }
  0x5f   : > { %2488 = vmatpush1.bf16.msra.mxu0 %v2487_v36  ;;  %v2525_v55 = vpack.c.bf16 %v344_v52, %v336_v51  ;;  %v341_v57 = vld [vmem:[#allocation2 + $0x60] sm:$0xff]  ;;  %v343_v59 = vld [vmem:[#allocation2 + $0x70] sm:$0xff]  ;;  %v350_v60 = vld [vmem:[#allocation2 + $0xa8] sm:$0xff] }
  0x60   : > { %2504 = vmatpush1.bf16.msra.mxu1 %v2503_v40  ;;  %2490 = vmatprep.subr.bf16.mxu0 %v2489_v41  ;;  %v358_v61 = vld [vmem:[#allocation2 + $0xe8] sm:$0xff]  ;;  %v2953_v62 = vld [vmem:[%s2950_s17] sm:$0xff]  ;;  %v352_v63 = vld [vmem:[#allocation2 + $0xb8] sm:$0xff]  ;;  %v2511_v2 = vpack.c.bf16 %v341_v57, %v333_v56  ;;  %v2527_v3 = vpack.c.bf16 %v343_v59, %v335_v58 }
  0x61   : > { %2506 = vmatprep.subr.bf16.mxu1 %v2505_v45  ;;  %v360_v1 = vld [vmem:[#allocation2 + $0xf8] sm:$0xff]  ;;  %v2513_v4 = vpack.c.bf16 %v358_v61, %v350_v60  ;;  %v349_v5 = vld [vmem:[#allocation2 + $0xa0] sm:$0xff]  ;;  %v351_v7 = vld [vmem:[#allocation2 + $0xb0] sm:$0xff] }
  0x62   : > { %v357_v6 = vld [vmem:[#allocation2 + $0xe0] sm:$0xff]  ;;  %v2529_v8 = vpack.c.bf16 %v360_v1, %v352_v63  ;;  %v359_v9 = vld [vmem:[#allocation2 + $0xf0] sm:$0xff]  ;;  %v366_v10 = vld [vmem:[#allocation2 + $0x128] sm:$0xff] }
  0x63   : > { %2492 = vmatpush1.bf16.msra.mxu0 %v2491_v50  ;;  %v374_v11 = vld [vmem:[#allocation2 + $0x168] sm:$0xff]  ;;  %v368_v13 = vld [vmem:[#allocation2 + $0x138] sm:$0xff]  ;;  %v2515_v15 = vpack.c.bf16 %v357_v6, %v349_v5  ;;  %v2531_v16 = vpack.c.bf16 %v359_v9, %v351_v7  ;;  %v365_v18 = vld [vmem:[#allocation2 + $0x120] sm:$0xff] }
  0x64   : > { %2508 = vmatpush1.bf16.msra.mxu1 %v2507_v53  ;;  %2510 = vmatprep.subr.bf16.mxu0 %v2509_v54  ;;  %v2961_v12 = vld [vmem:[%s2950_s17 + $0x8] sm:$0xff]  ;;  %v376_v14 = vld [vmem:[#allocation2 + $0x178] sm:$0xff]  ;;  %v2517_v17 = vpack.c.bf16 %v374_v11, %v366_v10  ;;  %v373_v19 = vld [vmem:[#allocation2 + $0x160] sm:$0xff]  ;;  %s2768_s17 = smov 32  }
  0x65   : > { %2526 = vmatprep.subr.bf16.mxu1 %v2525_v55  ;;  %v367_v20 = vld [vmem:[#allocation2 + $0x130] sm:$0xff]  ;;  %v2533_v21 = vpack.c.bf16 %v376_v14, %v368_v13  ;;  %v382_v23 = vld [vmem:[#allocation2 + $0x1a8] sm:$0xff]  ;;  %v384_v25 = vld [vmem:[#allocation2 + $0x1b8] sm:$0xff]  ;;  %v2519_v28 = vpack.c.bf16 %v373_v19, %v365_v18 }
  0x66   : > { %2427 = vmatmul.mubr.msk.f32.vlgmr.msra.gmra.mrb[0].mxu0 %vm393_vm0, %v2953_v62  ;;  %v375_v22 = vld [vmem:[#allocation2 + $0x170] sm:$0xff]  ;;  %v390_v24 = vld [vmem:[#allocation2 + $0x1e8] sm:$0xff]  ;;  %v392_v26 = vld [vmem:[#allocation2 + $0x1f8] sm:$0xff] }
  0x67   : > { %2429 = vmatmul.mubr.msk.f32.vlgmr.msra.gmra.mrb[0].mxu1 %vm393_vm0, %v2953_v62  ;;  %470 = vmatprep.mubr.f32.mxu0 %v4675_v0  ;;  %v2435_v27 = vld [vmem:[%s4668_s4 + $0x40] sm:$0xff]  ;;  %v2535_v30 = vpack.c.bf16 %v375_v22, %v367_v20  ;;  %v2521_v31 = vpack.c.bf16 %v390_v24, %v382_v23  ;;  %v2537_v34 = vpack.c.bf16 %v392_v26, %v384_v25  ;;  %v383_v35 = vld [vmem:[#allocation2 + $0x1b0] sm:$0xff]  ;;  %v2436_v37 = vld [vmem:[%s4668_s4 + $0x48] sm:$0xff] }
  0x68   : > { %547 = vmatprep.mubr.f32.mxu1 %v4675_v0  ;;  %2512 = vmatpush1.bf16.msra.mxu0 %v2511_v2  ;;  %v804_v29 = vld [vmem:[%s4668_s4] sm:$0xff]  ;;  %v391_v36 = vld [vmem:[#allocation2 + $0x1f0] sm:$0xff]  ;;  %v805_v41 = vld [vmem:[%s4668_s4 + $0x8] sm:$0xff] }
  0x69   : > { %2528 = vmatpush1.bf16.msra.mxu1 %v2527_v3  ;;  %2514 = vmatprep.subr.bf16.mxu0 %v2513_v4  ;;  %v381_v32 = vld [vmem:[#allocation2 + $0x1a0] sm:$0xff]  ;;  %v2437_v39 = vld [vmem:[%s4668_s4 + $0x10] sm:$0xff]  ;;  %v2539_v40 = vpack.c.bf16 %v391_v36, %v383_v35  ;;  %v2438_v43 = vld [vmem:[%s4668_s4 + $0x18] sm:$0xff] }
  0x6a   : > { %2428 = vmatmul.mubr.msk.f32.gmra.mrb[2].mxu0 %vm393_vm0, %v2961_v12  ;;  %2530 = vmatprep.subr.bf16.mxu1 %v2529_v8  ;;  %v389_v33 = vld [vmem:[#allocation2 + $0x1e0] sm:$0xff]  ;;  %v2441_v44 = vld [vmem:[%s4668_s4 + $0x30] sm:$0xff]  ;;  %v2440_v45 = vld [vmem:[%s4668_s4 + $0x28] sm:$0xff] }
  0x6b   : > { %2430 = vmatmul.mubr.msk.f32.gmra.mrb[2].mxu1 %vm393_vm0, %v2961_v12  ;;  %618 = vmatprep.mubr.f32.mxu0 %v4675_v0  ;;  %v2523_v38 = vpack.c.bf16 %v389_v33, %v381_v32  ;;  %v2439_v42 = vld [vmem:[%s4668_s4 + $0x20] sm:$0xff]  ;;  %v2444_v46 = vld [vmem:[%s4668_s4 + $0x58] sm:$0xff]  ;;  %v2446_v48 = vld [vmem:[%s4668_s4 + $0x68] sm:$0xff] }
  0x6c   : > { %2516 = vmatpush1.bf16.msra.mxu0 %v2515_v15  ;;  %695 = vmatprep.mubr.f32.mxu1 %v4675_v0  ;;  %v2442_v47 = vld [vmem:[%s4668_s4 + $0x38] sm:$0xff]  ;;  %v2443_v49 = vld [vmem:[%s4668_s4 + $0x50] sm:$0xff]  ;;  %v2445_v51 = vld [vmem:[%s4668_s4 + $0x60] sm:$0xff] }
  0x6d   : > { %2532 = vmatpush1.bf16.msra.mxu1 %v2531_v16  ;;  %2518 = vmatprep.subr.bf16.mxu0 %v2517_v17  ;;  %v2448_v50 = vld [vmem:[%s4668_s4 + $0x78] sm:$0xff]  ;;  %v2450_v52 = vld [vmem:[%s4668_s4 + $0x88] sm:$0xff]  ;;  %v2447_v53 = vld [vmem:[%s4668_s4 + $0x70] sm:$0xff] }
  0x6e   : > { %2534 = vmatprep.subr.bf16.mxu1 %v2533_v21  ;;  %729 = vperm.xlu0 %2631, %v2435_v27   ;;  %v2460_v54 = vld [vmem:[%s4668_s4 + $0x98] sm:$0xff]  ;;  %v2449_v55 = vld [vmem:[%s4668_s4 + $0x80] sm:$0xff]  ;;  %v2459_v56 = vld [vmem:[%s4668_s4 + $0x90] sm:$0xff] }
  0x6f   : > { %808 = vperm.xlu1 %2632, %v804_v29  }
  0x70   : > { %2520 = vmatpush1.bf16.msra.mxu0 %v2519_v28 }
  0x71   : > { %2536 = vmatpush1.bf16.msra.mxu1 %v2535_v30  ;;  %2522 = vmatprep.subr.bf16.mxu0 %v2521_v31 }
  0x72   : > { %2538 = vmatprep.subr.bf16.mxu1 %v2537_v34  ;;  %734 = vperm.xlu0 %2631, %v2436_v37  }
  0x73   : > { %950 = vperm.xlu1 %2632, %v2437_v39  }
  0x74   : > { %2524 = vmatpush1.bf16.msra.mxu0 %v2523_v38 }
  0x75   : > { %2540 = vmatpush1.bf16.msra.mxu1 %v2539_v40 }
  0x76   : > { %813 = vperm.xlu0 %2631, %v805_v41  }
  0x77   : > { %2431 = vmatmul.mubr.msk.f32.vlgmr.msra.gmra.mrb[4].mxu0 %vm393_vm0, %v2953_v62  ;;  %1092 = vperm.xlu1 %2632, %v2439_v42  }
  0x78   : > { %2433 = vmatmul.mubr.msk.f32.vlgmr.msra.gmra.mrb[4].mxu1 %vm393_vm0, %v2953_v62  ;;  %624 = vmatprep.mubr.f32.mxu0 %v4675_v0 }
  0x79   : > { %701 = vmatprep.mubr.f32.mxu1 %v4675_v0 }
  0x7a   : > { %955 = vperm.xlu0 %2631, %v2438_v43  }
  0x7b   : > { %2432 = vmatmul.mubr.msk.f32.gmra.mrb[6].mxu0 %vm393_vm0, %v2961_v12  ;;  %1234 = vperm.xlu1 %2632, %v2441_v44  }
  0x7c   : > { %2434 = vmatmul.mubr.msk.f32.gmra.mrb[6].mxu1 %vm393_vm0, %v2961_v12  ;;  %2028 = vmatprep.mubr.f32.mxu0 %v4675_v0 }
  0x7d   : > { %2105 = vmatprep.mubr.f32.mxu1 %v4675_v0 }
  0x7e   : > { %1097 = vperm.xlu0 %2631, %v2440_v45  }
  0x7f   : > { %1381 = vperm.xlu1 %2632, %v2444_v46  }
  0x82   : > { %1239 = vperm.xlu0 %2631, %v2442_v47  }
  0x83   : > { %1523 = vperm.xlu1 %2632, %v2446_v48  }
  0x86   : > { %1376 = vperm.xlu0 %2631, %v2443_v49  }
  0x87   : > { %1665 = vperm.xlu1 %2632, %v2448_v50  }
  0x8a   : > { %1518 = vperm.xlu0 %2631, %v2445_v51  }
  0x8b   : > { %1807 = vperm.xlu1 %2632, %v2450_v52  }
  0x8e   : > { %1660 = vperm.xlu0 %2631, %v2447_v53  }
  0x8f   : > { %1900 = vperm.xlu1 %2632, %v2460_v54   ;;  %v785_v54 = vlaneseq }
  0x91   : > { %v3330_v0 = vshrl.u32 %v785_v54, 7 }
  0x92   : > { %1802 = vperm.xlu0 %2631, %v2449_v55  }
  0x96   : > { %1895 = vperm.xlu0 %2631, %v2459_v56  }
  0xed   : > { %v3128_v10 = vpop.permute.xlu0 %729 }
  0xee   : > { %4826 = vst [vmem:[#allocation23_spill] sm:$0xff] %v3128_v10  ;;  %v3142_v12 = vpop.permute.xlu1 %808 }
  0xef   : > { %4827 = vst [vmem:[#allocation24_spill] sm:$0xff] %v3142_v12 }
  0xf1   : > { %v3136_v11 = vpop.permute.xlu0 %734 }
  0xf2   : > { %v3150_v14 = vpop.permute.xlu1 %950 }
  0xf3   : > { %4829 = vst [vmem:[#allocation26_spill] sm:$0xff] %v3150_v14 }
  0xf5   : > { %v3144_v13 = vpop.permute.xlu0 %813 }
  0xf6   : > { %4828 = vst [vmem:[#allocation25_spill] sm:$0xff] %v3144_v13  ;;  %v3162_v16 = vpop.permute.xlu1 %1092 }
  0xf7   : > { %4831 = vst [vmem:[#allocation28_spill] sm:$0xff] %v3162_v16 }
  0xf9   : > { %v3154_v15 = vpop.permute.xlu0 %955 }
  0xfa   : > { %4830 = vst [vmem:[#allocation27_spill] sm:$0xff] %v3154_v15  ;;  %v3170_v18 = vpop.permute.xlu1 %1234 }
  0xfd   : > { %v3164_v17 = vpop.permute.xlu0 %1097 }
  0xfe   : > { %4832 = vst [vmem:[#allocation29_spill] sm:$0xff] %v3164_v17  ;;  %v3182_v20 = vpop.permute.xlu1 %1381 }
  0xff   : > { %4834 = vst [vmem:[#allocation31_spill] sm:$0xff] %v3182_v20 }
 0x101   : > { %v3174_v19 = vpop.permute.xlu0 %1239 }
 0x102   : > { %4833 = vst [vmem:[#allocation30_spill] sm:$0xff] %v3174_v19  ;;  %v3190_v22 = vpop.permute.xlu1 %1523 }
 0x103   : > { %4836 = vst [vmem:[#allocation33_spill] sm:$0xff] %v3190_v22 }
 0x105   : > { %v3184_v21 = vpop.permute.xlu0 %1376 }
 0x106   : > { %4835 = vst [vmem:[#allocation32_spill] sm:$0xff] %v3184_v21  ;;  %v3202_v24 = vpop.permute.xlu1 %1665 }
 0x107   : > { %4838 = vst [vmem:[#allocation35_spill] sm:$0xff] %v3202_v24 }
 0x109   : > { %v3194_v23 = vpop.permute.xlu0 %1518 }
 0x10a   : > { %4837 = vst [vmem:[#allocation34_spill] sm:$0xff] %v3194_v23  ;;  %v3210_v26 = vpop.permute.xlu1 %1807 }
 0x10b   : > { %4840 = vst [vmem:[#allocation37_spill] sm:$0xff] %v3210_v26  ;;  %v3349_v26 = vand.u32 127, %v785_v54 }
 0x10d   : > { %v3204_v25 = vpop.permute.xlu0 %1660  ;;  %vm787_vm1 = vcmp.lt.s32.totalorder %v3349_v26, 33  ;;  %vm928_vm2 = vcmp.lt.s32.totalorder %v3349_v26, 32  ;;  %vm1070_vm3 = vcmp.lt.s32.totalorder %v3349_v26, 31  ;;  %vm1212_vm4 = vcmp.lt.s32.totalorder %v3349_v26, 1 }
 0x10e   : > { %4839 = vst [vmem:[#allocation36_spill] sm:$0xff] %v3204_v25  ;;  %v3222_v28 = vpop.permute.xlu1 %1900  ;;  %vm1354_vm5 = vcmp.lt.s32.totalorder %v3349_v26, 127  ;;  %vm1496_vm6 = vcmp.lt.s32.totalorder %v3349_v26, 97  ;;  %vm1638_vm7 = vcmp.lt.s32.totalorder %v3349_v26, 96  ;;  %vm1780_vm8 = vcmp.lt.s32.totalorder %v3349_v26, 95 }
 0x10f   : > { %4842 = vst [vmem:[#allocation39_spill] sm:$0xff] %v3222_v28  ;;  %v3341_v28 = vsub.s32 0, %v3330_v0 }
 0x111   : > { %v3214_v27 = vpop.permute.xlu0 %1802 }
 0x112   : > { %4841 = vst [vmem:[#allocation38_spill] sm:$0xff] %v3214_v27 }
 0x115   : > { %v3224_v29 = vpop.permute.xlu0 %1895 }
 0x116   : > { %4843 = vst [vmem:[#allocation40_spill] sm:$0xff] %v3224_v29  ;;  %v3345_v29 = vld [vmem:[#allocation5 + $0x10] sm:$0xff] }
 0x139   : > { %v3042_v57 = vpop.f32.mrb[0].mxu0 }
 0x13a   : > { %4815 = vst [vmem:[#allocation12_spill] sm:$0xff] %v3042_v57  ;;  %v3044_v58 = vpop.f32.mrb[0].mxu1  ;;  %753 = vrot.lane.b32.xlu1 %v3042_v57, %s2767_s14  ;;  %v3048_v59 = vpop.f32.mrb[1].mxu0 }
 0x13b   : > { %4816 = vst [vmem:[#allocation13_spill] sm:$0xff] %v3048_v59  ;;  %761 = vrot.lane.b32.xlu0 %v3044_v58, %s2767_s14  ;;  %v3052_v60 = vpop.f32.mrb[1].mxu1 }
 0x13d   : > { %v3054_v61 = vpop.f32.mrb[2].mxu0 }
 0x13e   : > { %4817 = vst [vmem:[#allocation14_spill] sm:$0xff] %v3054_v61  ;;  %755 = vrot.lane.b32.xlu1 %v3054_v61, %s2767_s14  ;;  %v3058_v62 = vpop.f32.mrb[3].mxu0  ;;  %v3060_v63 = vpop.f32.mrb[2].mxu1 }
 0x13f   : > { %4818 = vst [vmem:[#allocation15_spill] sm:$0xff] %v3058_v62  ;;  %896 = vrot.lane.b32.xlu0 %v3042_v57, %s2768_s17  ;;  %v3064_v1 = vpop.f32.mrb[3].mxu1 }
 0x142   : > { %763 = vrot.lane.b32.xlu1 %v3060_v63, %s2767_s14 }
 0x143   : > { %904 = vrot.lane.b32.xlu0 %v3044_v58, %s2768_s17 }
 0x146   : > { %898 = vrot.lane.b32.xlu1 %v3054_v61, %s2768_s17 }
 0x147   : > { %1038 = vrot.lane.b32.xlu0 %v3042_v57, %s2769_s20 }
 0x14a   : > { %906 = vrot.lane.b32.xlu1 %v3060_v63, %s2768_s17  ;;  %v3076_v2 = vpop.f32.mrb[4].mxu0 }
 0x14b   : > { %4819 = vst [vmem:[#allocation16_spill] sm:$0xff] %v3076_v2  ;;  %1046 = vrot.lane.b32.xlu0 %v3044_v58, %s2769_s20  ;;  %v3080_v3 = vpop.f32.mrb[4].mxu1  ;;  %v3082_v4 = vpop.f32.mrb[5].mxu0 }
 0x14c   : > { %4820 = vst [vmem:[#allocation17_spill] sm:$0xff] %v3080_v3  ;;  %4821 = vst [vmem:[#allocation18_spill] sm:$0xff] %v3082_v4  ;;  %v3084_v5 = vpop.f32.mrb[5].mxu1 }
 0x14e   : > { %1040 = vrot.lane.b32.xlu1 %v3054_v61, %s2769_s20  ;;  %v3088_v6 = vpop.f32.mrb[6].mxu0 }
 0x14f   : > { %4822 = vst [vmem:[#allocation19_spill] sm:$0xff] %v3088_v6  ;;  %1180 = vrot.lane.b32.xlu0 %v3042_v57, %s2770_s21  ;;  %v3092_v7 = vpop.f32.mrb[6].mxu1  ;;  %v3094_v8 = vpop.f32.mrb[7].mxu0 }
 0x150   : > { %4823 = vst [vmem:[#allocation20_spill] sm:$0xff] %v3092_v7  ;;  %4824 = vst [vmem:[#allocation21_spill] sm:$0xff] %v3094_v8  ;;  %v3096_v9 = vpop.f32.mrb[7].mxu1 }
 0x151   : > { %4825 = vst [vmem:[#allocation22_spill] sm:$0xff] %v3096_v9 }
 0x152   : > { %1048 = vrot.lane.b32.xlu1 %v3060_v63, %s2769_s20 }
 0x153   : > { %1188 = vrot.lane.b32.xlu0 %v3044_v58, %s2770_s21 }
 0x156   : > { %1182 = vrot.lane.b32.xlu1 %v3054_v61, %s2770_s21 }
 0x157   : > { %1330 = vrot.lane.b32.xlu0 %v3044_v58, %s2771_s22 }
 0x15a   : > { %1190 = vrot.lane.b32.xlu1 %v3060_v63, %s2770_s21 }
 0x15b   : > { %1322 = vrot.lane.b32.xlu0 %v3042_v57, %s2771_s22 }
 0x15e   : > { %1332 = vrot.lane.b32.xlu1 %v3060_v63, %s2771_s22 }
 0x15f   : > { %1472 = vrot.lane.b32.xlu0 %v3044_v58, %s2772_s23 }
 0x162   : > { %1324 = vrot.lane.b32.xlu1 %v3054_v61, %s2771_s22 }
 0x163   : > { %1464 = vrot.lane.b32.xlu0 %v3042_v57, %s2772_s23 }
 0x166   : > { %1474 = vrot.lane.b32.xlu1 %v3060_v63, %s2772_s23 }
 0x167   : > { %1614 = vrot.lane.b32.xlu0 %v3044_v58, %s2773_s29 }
 0x16a   : > { %1466 = vrot.lane.b32.xlu1 %v3054_v61, %s2772_s23 }
 0x16b   : > { %1606 = vrot.lane.b32.xlu0 %v3042_v57, %s2773_s29 }
 0x16e   : > { %1616 = vrot.lane.b32.xlu1 %v3060_v63, %s2773_s29 }
 0x16f   : > { %1756 = vrot.lane.b32.xlu0 %v3044_v58, %s2774_s8 }
 0x172   : > { %1608 = vrot.lane.b32.xlu1 %v3054_v61, %s2773_s29 }
 0x173   : > { %1748 = vrot.lane.b32.xlu0 %v3042_v57, %s2774_s8 }
 0x176   : > { %1758 = vrot.lane.b32.xlu1 %v3060_v63, %s2774_s8 }
 0x177   : > { %757 = vrot.lane.b32.xlu0 %v3048_v59, %s2767_s14 }
 0x17a   : > { %1750 = vrot.lane.b32.xlu1 %v3054_v61, %s2774_s8 }
 0x17b   : > { %765 = vrot.lane.b32.xlu0 %v3052_v60, %s2767_s14 }
 0x17e   : > { %759 = vrot.lane.b32.xlu1 %v3058_v62, %s2767_s14 }
 0x17f   : > { %900 = vrot.lane.b32.xlu0 %v3048_v59, %s2768_s17 }
 0x182   : > { %767 = vrot.lane.b32.xlu1 %v3064_v1, %s2767_s14 }
 0x183   : > { %908 = vrot.lane.b32.xlu0 %v3052_v60, %s2768_s17 }
 0x186   : > { %902 = vrot.lane.b32.xlu1 %v3058_v62, %s2768_s17 }
 0x187   : > { %1042 = vrot.lane.b32.xlu0 %v3048_v59, %s2769_s20 }
 0x18a   : > { %910 = vrot.lane.b32.xlu1 %v3064_v1, %s2768_s17 }
 0x18b   : > { %1050 = vrot.lane.b32.xlu0 %v3052_v60, %s2769_s20 }
 0x18e   : > { %1044 = vrot.lane.b32.xlu1 %v3058_v62, %s2769_s20 }
 0x18f   : > { %1184 = vrot.lane.b32.xlu0 %v3048_v59, %s2770_s21 }
 0x192   : > { %1052 = vrot.lane.b32.xlu1 %v3064_v1, %s2769_s20 }
 0x193   : > { %1192 = vrot.lane.b32.xlu0 %v3052_v60, %s2770_s21 }
 0x196   : > { %1186 = vrot.lane.b32.xlu1 %v3058_v62, %s2770_s21 }
 0x197   : > { %1326 = vrot.lane.b32.xlu0 %v3048_v59, %s2771_s22 }
 0x19a   : > { %1194 = vrot.lane.b32.xlu1 %v3064_v1, %s2770_s21 }
 0x19b   : > { %1334 = vrot.lane.b32.xlu0 %v3052_v60, %s2771_s22 }
 0x19e   : > { %1328 = vrot.lane.b32.xlu1 %v3058_v62, %s2771_s22 }
 0x19f   : > { %1468 = vrot.lane.b32.xlu0 %v3048_v59, %s2772_s23 }
 0x1a2   : > { %1336 = vrot.lane.b32.xlu1 %v3064_v1, %s2771_s22 }
 0x1a3   : > { %1476 = vrot.lane.b32.xlu0 %v3052_v60, %s2772_s23 }
 0x1a6   : > { %1470 = vrot.lane.b32.xlu1 %v3058_v62, %s2772_s23 }
 0x1a7   : > { %1610 = vrot.lane.b32.xlu0 %v3048_v59, %s2773_s29 }
 0x1aa   : > { %1478 = vrot.lane.b32.xlu1 %v3064_v1, %s2772_s23 }
 0x1ab   : > { %1618 = vrot.lane.b32.xlu0 %v3052_v60, %s2773_s29 }
 0x1ac   : > { %v3230_v30 = vpop.permute.xlu1 %753 }
 0x1ad   : > { %4844 = vst [vmem:[#allocation41_spill] sm:$0xff] %v3230_v30  ;;  %v3232_v31 = vpop.permute.xlu0 %761 }
 0x1ae   : > { %1612 = vrot.lane.b32.xlu1 %v3058_v62, %s2773_s29 }
 0x1af   : > { %1752 = vrot.lane.b32.xlu0 %v3048_v59, %s2774_s8 }
 0x1b0   : > { %v3238_v32 = vpop.permute.xlu1 %755 }
 0x1b1   : > { %4845 = vst [vmem:[#allocation42_spill] sm:$0xff] %v3238_v32  ;;  %v3240_v33 = vpop.permute.xlu0 %896 }
 0x1b2   : > { %4846 = vst [vmem:[#allocation43_spill] sm:$0xff] %v3240_v33  ;;  %1620 = vrot.lane.b32.xlu1 %v3064_v1, %s2773_s29 }
 0x1b3   : > { %1760 = vrot.lane.b32.xlu0 %v3052_v60, %s2774_s8 }
 0x1b4   : > { %v3246_v34 = vpop.permute.xlu1 %763 }
 0x1b5   : > { %v3248_v35 = vpop.permute.xlu0 %904 }
 0x1b6   : > { %1754 = vrot.lane.b32.xlu1 %v3058_v62, %s2774_s8 }
 0x1b7   : > { %769 = vrot.lane.b32.xlu0 %v3076_v2, %s2767_s14 }
 0x1b8   : > { %v3254_v36 = vpop.permute.xlu1 %898 }
 0x1b9   : > { %4847 = vst [vmem:[#allocation44_spill] sm:$0xff] %v3254_v36  ;;  %v3256_v37 = vpop.permute.xlu0 %1038 }
 0x1ba   : > { %4848 = vst [vmem:[#allocation45_spill] sm:$0xff] %v3256_v37  ;;  %1762 = vrot.lane.b32.xlu1 %v3064_v1, %s2774_s8 }
 0x1bb   : > { %777 = vrot.lane.b32.xlu0 %v3080_v3, %s2767_s14 }
 0x1bc   : > { %v3262_v38 = vpop.permute.xlu1 %906 }
 0x1bd   : > { %v3264_v39 = vpop.permute.xlu0 %1046 }
 0x1be   : > { %4849 = vst [vmem:[#allocation46_spill] sm:$0xff] %v3264_v39  ;;  %771 = vrot.lane.b32.xlu1 %v3088_v6, %s2767_s14 }
 0x1bf   : > { %1338 = vrot.lane.b32.xlu0 %v3076_v2, %s2771_s22 }
 0x1c0   : > { %v3270_v40 = vpop.permute.xlu1 %1040 }
 0x1c1   : > { %4850 = vst [vmem:[#allocation47_spill] sm:$0xff] %v3270_v40  ;;  %v3272_v41 = vpop.permute.xlu0 %1180 }
 0x1c2   : > { %4851 = vst [vmem:[#allocation48_spill] sm:$0xff] %v3272_v41  ;;  %779 = vrot.lane.b32.xlu1 %v3092_v7, %s2767_s14 }
 0x1c3   : > { %912 = vrot.lane.b32.xlu0 %v3076_v2, %s2768_s17 }
 0x1c4   : > { %v3278_v42 = vpop.permute.xlu1 %1048 }
 0x1c5   : > { %4852 = vst [vmem:[#allocation49_spill] sm:$0xff] %v3278_v42  ;;  %v3280_v43 = vpop.permute.xlu0 %1188 }
 0x1c6   : > { %4853 = vst [vmem:[#allocation50_spill] sm:$0xff] %v3280_v43  ;;  %1340 = vrot.lane.b32.xlu1 %v3088_v6, %s2771_s22 }
 0x1c7   : > { %920 = vrot.lane.b32.xlu0 %v3080_v3, %s2768_s17 }
 0x1c8   : > { %v3286_v44 = vpop.permute.xlu1 %1182 }
 0x1c9   : > { %4854 = vst [vmem:[#allocation51_spill] sm:$0xff] %v3286_v44  ;;  %v3288_v45 = vpop.permute.xlu0 %1330 }
 0x1ca   : > { %914 = vrot.lane.b32.xlu1 %v3088_v6, %s2768_s17 }
 0x1cb   : > { %1480 = vrot.lane.b32.xlu0 %v3076_v2, %s2772_s23 }
 0x1cc   : > { %v3294_v46 = vpop.permute.xlu1 %1190 }
 0x1cd   : > { %4855 = vst [vmem:[#allocation52_spill] sm:$0xff] %v3294_v46  ;;  %v3296_v47 = vpop.permute.xlu0 %1322 }
 0x1ce   : > { %4856 = vst [vmem:[#allocation53_spill] sm:$0xff] %v3296_v47  ;;  %922 = vrot.lane.b32.xlu1 %v3092_v7, %s2768_s17 }
 0x1cf   : > { %1054 = vrot.lane.b32.xlu0 %v3076_v2, %s2769_s20 }
 0x1d0   : > { %v3302_v48 = vpop.permute.xlu1 %1332 }
 0x1d1   : > { %v3304_v49 = vpop.permute.xlu0 %1472 }
 0x1d2   : > { %4857 = vst [vmem:[#allocation54_spill] sm:$0xff] %v3304_v49  ;;  %1482 = vrot.lane.b32.xlu1 %v3088_v6, %s2772_s23 }
 0x1d3   : > { %1062 = vrot.lane.b32.xlu0 %v3080_v3, %s2769_s20 }
 0x1d4   : > { %v3310_v50 = vpop.permute.xlu1 %1324 }
 0x1d5   : > { %4858 = vst [vmem:[#allocation55_spill] sm:$0xff] %v3310_v50  ;;  %v3312_v51 = vpop.permute.xlu0 %1464 }
 0x1d6   : > { %4859 = vst [vmem:[#allocation56_spill] sm:$0xff] %v3312_v51  ;;  %1056 = vrot.lane.b32.xlu1 %v3088_v6, %s2769_s20 }
 0x1d7   : > { %1622 = vrot.lane.b32.xlu0 %v3076_v2, %s2773_s29 }
 0x1d8   : > { %v3318_v52 = vpop.permute.xlu1 %1474 }
 0x1d9   : > { %4860 = vst [vmem:[#allocation57_spill] sm:$0xff] %v3318_v52  ;;  %v3320_v53 = vpop.permute.xlu0 %1614 }
 0x1da   : > { %4861 = vst [vmem:[#allocation58_spill] sm:$0xff] %v3320_v53  ;;  %1064 = vrot.lane.b32.xlu1 %v3092_v7, %s2769_s20  ;;  %v3372_v53 = vsub.s32 1, %v3330_v0 }
 0x1db   : > { %1196 = vrot.lane.b32.xlu0 %v3076_v2, %s2770_s21 }
 0x1dc   : > { %v3326_v55 = vpop.permute.xlu1 %1466  ;;  %4869 = vst [vmem:[#allocation66_spill] sm:$0xff] %v3372_v53  ;;  %v969_v41 = vrot.slane %v3345_v29, %v3372_v53 }
 0x1dd   : > { %4862 = vst [vmem:[#allocation59_spill] sm:$0xff] %v3326_v55  ;;  %v3328_v56 = vpop.permute.xlu0 %1606 }
 0x1de   : > { %4863 = vst [vmem:[#allocation60_spill] sm:$0xff] %v3328_v56  ;;  %1624 = vrot.lane.b32.xlu1 %v3088_v6, %s2773_s29 }
 0x1df   : > { %1204 = vrot.lane.b32.xlu0 %v3080_v3, %s2770_s21 }
 0x1e0   : > { %v3336_v61 = vpop.permute.xlu1 %1616 }
 0x1e1   : > { %4864 = vst [vmem:[#allocation61_spill] sm:$0xff] %v3336_v61  ;;  %v3338_v57 = vpop.permute.xlu0 %1756  ;;  %v827_v61 = vrot.slane %v3345_v29, %v3341_v28 }
 0x1e2   : > { %4865 = vst [vmem:[#allocation62_spill] sm:$0xff] %v3338_v57  ;;  %1198 = vrot.lane.b32.xlu1 %v3088_v6, %s2770_s21  ;;  %v3359_v57 = vld [vmem:[#allocation5 + $0x18] sm:$0xff] }
 0x1e3   : > { %1764 = vrot.lane.b32.xlu0 %v3076_v2, %s2774_s8  ;;  %v850_v54 = vmul.f32 %v827_v61, %v3142_v12 }
 0x1e4   : > { %v3351_v52 = vpop.permute.xlu1 %1608 }
 0x1e5   : > { %4866 = vst [vmem:[#allocation63_spill] sm:$0xff] %v3351_v52  ;;  %v3353_v24 = vpop.permute.xlu0 %1748 }
 0x1e6   : > { %4867 = vst [vmem:[#allocation64_spill] sm:$0xff] %v3353_v24  ;;  %1206 = vrot.lane.b32.xlu1 %v3092_v7, %s2770_s21  ;;  %v831_v24 = vrot.slane %v3359_v57, %v3341_v28 }
 0x1e7   : > { %1346 = vrot.lane.b32.xlu0 %v3080_v3, %s2771_s22 }
 0x1e8   : > { %v3364_v2 = vpop.permute.xlu1 %1758  ;;  %v851_v55 = vmul.f32 %v831_v24, %v3142_v12  ;;  %v859_v62 = vmul.f32 %v831_v24, %v3144_v13 }
 0x1e9   : > { %4868 = vst [vmem:[#allocation65_spill] sm:$0xff] %v3364_v2  ;;  %v3367_v52 = vpop.permute.xlu0 %757  ;;  %v739_v2 = vmul.f32 %v3128_v10, %v3044_v58  ;;  %v740_v58 = vmul.f32 %v3128_v10, %v3052_v60 }
 0x1ea   : > { %v798_v27 = vsel %vm787_vm1, %v3367_v52, %v3232_v31  ;;  %1766 = vrot.lane.b32.xlu1 %v3088_v6, %s2774_s8 }
 0x1eb   : > { %v866_v49 = vmul.f32 %v850_v54, %v798_v27  ;;  %781 = vrot.lane.b32.xlu0 %v3084_v5, %s2767_s14  ;;  %v3406_v54 = vsub.s32 2, %v3330_v0 }
 0x1ec   : > { %v3384_v44 = vpop.permute.xlu1 %1750 }
 0x1ed   : > { %4870 = vst [vmem:[#allocation67_spill] sm:$0xff] %v3384_v44  ;;  %v882_v56 = vadd.f32 %v866_v49, %v739_v2  ;;  %v3387_v40 = vpop.permute.xlu0 %765  ;;  %v858_v2 = vmul.f32 %v827_v61, %v3144_v13  ;;  %4872 = vst [vmem:[#allocation69_spill] sm:$0xff] %v3406_v54  ;;  %v992_v44 = vmul.f32 %v969_v41, %v3150_v14 }
 0x1ee   : > { %4871 = vst [vmem:[#allocation68_spill] sm:$0xff] %v3387_v40  ;;  %v796_v6 = vsel %vm787_vm1, %v3232_v31, %v3387_v40  ;;  %1348 = vrot.lane.b32.xlu1 %v3092_v7, %s2771_s22 }
 0x1ef   : > { %v867_v27 = vmul.f32 %v851_v55, %v796_v6  ;;  %924 = vrot.lane.b32.xlu0 %v3084_v5, %s2768_s17  ;;  %v973_v6 = vrot.slane %v3359_v57, %v3372_v53  ;;  %v747_v55 = vmul.f32 %v3136_v11, %v3060_v63 }
 0x1f0   : > { %v3403_v49 = vpop.permute.xlu1 %759 }
 0x1f1   : > { %v883_v31 = vadd.f32 %v867_v27, %v740_v58  ;;  %v3409_v40 = vpop.permute.xlu0 %900  ;;  %v799_v60 = vsel %vm787_vm1, %v3403_v49, %v3246_v34  ;;  %v993_v10 = vmul.f32 %v973_v6, %v3150_v14 }
 0x1f2   : > { %v939_v61 = vsel %vm928_vm2, %v3409_v40, %v3248_v35  ;;  %v874_v58 = vmul.f32 %v858_v2, %v799_v60  ;;  %783 = vrot.lane.b32.xlu1 %v3096_v9, %s2767_s14 }
 0x1f3   : > { %v1008_v27 = vmul.f32 %v992_v44, %v939_v61  ;;  %1066 = vrot.lane.b32.xlu0 %v3084_v5, %s2769_s20  ;;  %v1111_v44 = vrot.slane %v3345_v29, %v3406_v54  ;;  %v1000_v61 = vmul.f32 %v969_v41, %v3154_v15 }
 0x1f4   : > { %v890_v7 = vadd.f32 %v874_v58, %v747_v55  ;;  %v3428_v3 = vpop.permute.xlu1 %767 }
 0x1f5   : > { %4873 = vst [vmem:[#allocation70_spill] sm:$0xff] %v3428_v3  ;;  %v1024_v36 = vadd.f32 %v1008_v27, %v882_v56  ;;  %v3431_v59 = vpop.permute.xlu0 %908  ;;  %v797_v63 = vsel %vm787_vm1, %v3246_v34, %v3428_v3  ;;  %v748_v56 = vmul.f32 %v3136_v11, %v3064_v1 }
 0x1f6   : > { %4874 = vst [vmem:[#allocation71_spill] sm:$0xff] %v3431_v59  ;;  %v937_v24 = vsel %vm928_vm2, %v3248_v35, %v3431_v59  ;;  %v875_v2 = vmul.f32 %v859_v62, %v797_v63  ;;  %926 = vrot.lane.b32.xlu1 %v3096_v9, %s2768_s17  ;;  %v1134_v35 = vmul.f32 %v1111_v44, %v3162_v16 }
 0x1f7   : > { %v1009_v60 = vmul.f32 %v993_v10, %v937_v24  ;;  %1208 = vrot.lane.b32.xlu0 %v3084_v5, %s2770_s21  ;;  %v3463_v10 = vsub.s32 3, %v3330_v0  ;;  %v1001_v24 = vmul.f32 %v973_v6, %v3154_v15 }
 0x1f8   : > { %v891_v34 = vadd.f32 %v875_v2, %v748_v56  ;;  %v3451_v55 = vpop.permute.xlu1 %902 }
 0x1f9   : > { %v3453_v58 = vadd.f32 %v1009_v60, %v883_v31  ;;  %v3456_v1 = vpop.permute.xlu0 %1042  ;;  %v940_v62 = vsel %vm928_vm2, %v3451_v55, %v3262_v38  ;;  %4876 = vst [vmem:[#allocation73_spill] sm:$0xff] %v3463_v10 }
 0x1fa   : > { %v1081_v41 = vsel %vm1070_vm3, %v3456_v1, %v3264_v39  ;;  %v1016_v27 = vmul.f32 %v1000_v61, %v940_v62  ;;  %1068 = vrot.lane.b32.xlu1 %v3096_v9, %s2769_s20  ;;  %v1253_v62 = vrot.slane %v3345_v29, %v3463_v10 }
 0x1fb   : > { %4875 = vst [vmem:[#allocation72_spill] sm:$0xff] %v3453_v58  ;;  %v1150_v31 = vmul.f32 %v1134_v35, %v1081_v41  ;;  %773 = vrot.lane.b32.xlu0 %v3082_v4, %s2767_s14 }
 0x1fc   : > { %v1032_v63 = vadd.f32 %v1016_v27, %v890_v7  ;;  %v3474_v56 = vpop.permute.xlu1 %910 }
 0x1fd   : > { %4877 = vst [vmem:[#allocation74_spill] sm:$0xff] %v3474_v56  ;;  %v1166_v2 = vadd.f32 %v1150_v31, %v1024_v36  ;;  %v3476_v60 = vpop.permute.xlu0 %1050  ;;  %v938_v61 = vsel %vm928_vm2, %v3262_v38, %v3474_v56  ;;  %v1142_v36 = vmul.f32 %v1111_v44, %v3164_v17  ;;  %v1276_v38 = vmul.f32 %v1253_v62, %v3170_v18 }
 0x1fe   : > { %4878 = vst [vmem:[#allocation75_spill] sm:$0xff] %v3476_v60  ;;  %v1017_v35 = vmul.f32 %v1001_v24, %v938_v61  ;;  %1210 = vrot.lane.b32.xlu1 %v3096_v9, %s2770_s21  ;;  %v3502_v31 = vsub.s32 5, %v3330_v0  ;;  %v3510_v24 = vld [vmem:[#allocation5] sm:$0xff] }
 0x1ff   : > { %916 = vrot.lane.b32.xlu0 %v3082_v4, %s2768_s17  ;;  %4880 = vst [vmem:[#allocation77_spill] sm:$0xff] %v3510_v24 }
 0x200   : > { %v3489_v7 = vadd.f32 %v1017_v35, %v891_v34  ;;  %v3492_v6 = vpop.permute.xlu1 %1044 }
 0x201   : > { %v3495_v41 = vpop.permute.xlu0 %1184  ;;  %v1082_v27 = vsel %vm1070_vm3, %v3492_v6, %v3278_v42 }
 0x202   : > { %4879 = vst [vmem:[#allocation76_spill] sm:$0xff] %v3489_v7  ;;  %v1223_v34 = vsel %vm1212_vm4, %v3495_v41, %v3280_v43  ;;  %v1158_v44 = vmul.f32 %v1142_v36, %v1082_v27  ;;  %775 = vrot.lane.b32.xlu1 %v3094_v8, %s2767_s14  ;;  %v3516_v7 = vld [vmem:[#allocation5 + $0x8] sm:$0xff]  ;;  %v1387_v36 = vrot.slane %v3510_v24, %v3502_v31  ;;  %s4225_s14 = scalar_lea.vmem %s4665_s1, %s2475_s16  ;;  %s4615_s16 = scalar_lea.hbm %s4671_s7, %s2476_s9 }
 0x203   : > { %v1292_v61 = vmul.f32 %v1276_v38, %v1223_v34  ;;  %1058 = vrot.lane.b32.xlu0 %v3082_v4, %s2769_s20  ;;  %v965_v38 = vrot.slane %v3516_v7, %v3372_v53  ;;  %v3535_v34 = vsub.s32 6, %v3330_v0  ;;  %v3556_v43 = vrot.slane %v3359_v57, %v3406_v54 }
 0x204   : > { %v1174_v35 = vadd.f32 %v1158_v44, %v1032_v63  ;;  %v3514_v56 = vpop.permute.xlu1 %1052  ;;  %v823_v63 = vrot.slane %v3516_v7, %v3341_v28  ;;  %v1107_v44 = vrot.slane %v3516_v7, %v3406_v54 }
 0x205   : > { %4881 = vst [vmem:[#allocation78_spill] sm:$0xff] %v3514_v56  ;;  %v1308_v59 = vadd.f32 %v1292_v61, %v1166_v2  ;;  %v3518_v3 = vpop.permute.xlu0 %1192  ;;  %v1284_v2 = vmul.f32 %v1253_v62, %v3174_v19  ;;  %4883 = vst [vmem:[#allocation80_spill] sm:$0xff] %v3535_v34  ;;  %v1416_v61 = vmul.f32 %v1387_v36, %v3184_v21 }
 0x206   : > { %4882 = vst [vmem:[#allocation79_spill] sm:$0xff] %v3518_v3  ;;  %918 = vrot.lane.b32.xlu1 %v3094_v8, %s2768_s17  ;;  %v1395_v62 = vrot.slane %v3345_v29, %v3502_v31  ;;  %4884 = vst [vmem:[#allocation81_spill] sm:$0xff] %v3556_v43  ;;  %v849_v39 = vmul.f32 %v823_v63, %v3142_v12  ;;  %v857_v54 = vmul.f32 %v823_v63, %v3144_v13 }
 0x207   : > { %1200 = vrot.lane.b32.xlu0 %v3082_v4, %s2770_s21  ;;  %v999_v12 = vmul.f32 %v965_v38, %v3154_v15  ;;  %v3594_v63 = vmul.f32 %v3556_v43, %v3162_v16  ;;  %v1533_v15 = vrot.slane %v3516_v7, %v3535_v34 }
 0x208   : > { %v3532_v27 = vpop.permute.xlu1 %1186 }
 0x209   : > { %v3540_v42 = vpop.permute.xlu0 %1326  ;;  %v1224_v56 = vsel %vm1212_vm4, %v3532_v27, %v3294_v46  ;;  %v3563_v46 = vsub.s32 7, %v3330_v0  ;;  %v1529_v0 = vrot.slane %v3510_v24, %v3535_v34 }
 0x20a   : > { %v1367_v58 = vsel %vm1354_vm5, %v3296_v47, %v3540_v42  ;;  %v1300_v53 = vmul.f32 %v1284_v2, %v1224_v56  ;;  %1060 = vrot.lane.b32.xlu1 %v3094_v8, %s2769_s20  ;;  %v991_v47 = vmul.f32 %v965_v38, %v3150_v14  ;;  %v1249_v56 = vrot.slane %v3516_v7, %v3463_v10 }
 0x20b   : > { %v3558_v3 = vmul.f32 %v1416_v61, %v1367_v58  ;;  %1342 = vrot.lane.b32.xlu0 %v3082_v4, %s2771_s22  ;;  %4886 = vst [vmem:[#allocation83_spill] sm:$0xff] %v3563_v46  ;;  %v1133_v58 = vmul.f32 %v1107_v44, %v3162_v16  ;;  %v1418_v61 = vmul.f32 %v1395_v62, %v3184_v21 }
 0x20c   : > { %v1316_v2 = vadd.f32 %v1300_v53, %v1174_v35  ;;  %v3569_v60 = vpop.permute.xlu1 %1194  ;;  %v3580_v14 = vmul.f32 %v1107_v44, %v3164_v17  ;;  %v3584_v53 = vrot.slane %v3359_v57, %v3463_v10  ;;  %v1391_v38 = vrot.slane %v3516_v7, %v3502_v31 }
 0x20d   : > { %4885 = vst [vmem:[#allocation82_spill] sm:$0xff] %v3558_v3  ;;  %4887 = vst [vmem:[#allocation84_spill] sm:$0xff] %v3569_v60  ;;  %v3574_v3 = vpop.permute.xlu0 %1334  ;;  %v1275_v10 = vmul.f32 %v1249_v56, %v3170_v18  ;;  %v1424_v60 = vmul.f32 %v1387_v36, %v3182_v20  ;;  %v1537_v16 = vrot.slane %v3345_v29, %v3535_v34 }
 0x20e   : > { %4888 = vst [vmem:[#allocation85_spill] sm:$0xff] %v3574_v3  ;;  %v1363_v35 = vsel %vm1354_vm5, %v3288_v45, %v3574_v3  ;;  %1202 = vrot.lane.b32.xlu1 %v3094_v8, %s2770_s21  ;;  %v3610_v13 = vmul.f32 %v1249_v56, %v3174_v19  ;;  %v800_v36 = vsel %vm787_vm1, %v3230_v30, %v3367_v52 }
 0x20f   : > { %v1434_v44 = vmul.f32 %v1418_v61, %v1363_v35  ;;  %1350 = vrot.lane.b32.xlu0 %v3084_v5, %s2771_s22  ;;  %v1558_v35 = vmul.f32 %v1529_v0, %v3194_v23  ;;  %v3638_v19 = vmul.f32 %v1391_v38, %v3182_v20  ;;  %v941_v52 = vsel %vm928_vm2, %v3240_v33, %v3409_v40  ;;  %v4893_v33 = vld [vmem:[#allocation23_spill] sm:$0xff] }
 0x210   : > { %v3605_v3 = vpop.permute.xlu1 %1328 }
 0x211   : > { %v3612_v61 = vadd.f32 %v1434_v44, %v1308_v59  ;;  %v1469_v43 = vpop.permute.xlu0 %1468  ;;  %v1368_v17 = vsel %vm1354_vm5, %v3310_v50, %v3605_v3  ;;  %v3632_v59 = vrot.slane %v3510_v24, %v3563_v46  ;;  %v1417_v44 = vmul.f32 %v1391_v38, %v3184_v21  ;;  %v4894_v24 = vld [vmem:[#allocation44_spill] sm:$0xff]  ;;  %v4899_v21 = vld [vmem:[#allocation59_spill] sm:$0xff] }
 0x212   : > { %v1509_v56 = vsel %vm1496_vm6, %v3312_v51, %v1469_v43  ;;  %v3626_v34 = vmul.f32 %v1424_v60, %v1368_v17  ;;  %1344 = vrot.lane.b32.xlu1 %v3094_v8, %s2771_s22  ;;  %v1426_v17 = vmul.f32 %v1395_v62, %v3182_v20  ;;  %v1559_v60 = vmul.f32 %v1533_v15, %v3194_v23 }
 0x213   : > { %v3635_v50 = vmul.f32 %v1558_v35, %v1509_v56  ;;  %1484 = vrot.lane.b32.xlu0 %v3082_v4, %s2772_s23  ;;  %v3649_v51 = vmul.f32 %v1537_v16, %v3194_v23  ;;  %v3655_v38 = vrot.slane %v3516_v7, %v3563_v46  ;;  %v865_v56 = vmul.f32 %v849_v39, %v800_v36 }
 0x214   : > { %4889 = vst [vmem:[#allocation86_spill] sm:$0xff] %v3626_v34  ;;  %v3651_v35 = vpop.permute.xlu1 %1336  ;;  %v801_v62 = vsel %vm787_vm1, %v3238_v32, %v3403_v49  ;;  %v1083_v7 = vsel %vm1070_vm3, %v3256_v37, %v3456_v1  ;;  %v1700_v49 = vmul.f32 %v3632_v59, %v3204_v25  ;;  %v3678_v36 = vrot.slane %v3345_v29, %v3563_v46  ;;  %v4892_v32 = vld [vmem:[#allocation13_spill] sm:$0xff]  ;;  %v4897_v29 = vld [vmem:[#allocation48_spill] sm:$0xff] }
 0x215   : > { %4890 = vst [vmem:[#allocation87_spill] sm:$0xff] %v3635_v50  ;;  %4891 = vst [vmem:[#allocation88_spill] sm:$0xff] %v3651_v35  ;;  %v3661_v34 = vpop.permute.xlu0 %1476  ;;  %v1364_v40 = vsel %vm1354_vm5, %v3302_v48, %v3651_v35  ;;  %v1566_v50 = vmul.f32 %v1529_v0, %v3190_v22  ;;  %v738_v30 = vmul.f32 %v4893_v33, %v4892_v32 }
 0x216   : > { %v1442_v39 = vmul.f32 %v1426_v17, %v1364_v40  ;;  %1352 = vrot.lane.b32.xlu1 %v3096_v9, %s2771_s22  ;;  %v1007_v0 = vmul.f32 %v991_v47, %v941_v52  ;;  %v942_v1 = vsel %vm928_vm2, %v4894_v24, %v3451_v55  ;;  %v4895_v17 = vld [vmem:[#allocation17_spill] sm:$0xff]  ;;  %v4896_v40 = vld [vmem:[#allocation15_spill] sm:$0xff]  ;;  %v873_v23 = vmul.f32 %v857_v54, %v801_v62 }
 0x217   : > { %1488 = vrot.lane.b32.xlu0 %v4895_v17, %s2772_s23  ;;  %v746_v37 = vmul.f32 %v3136_v11, %v4896_v40  ;;  %v1225_v32 = vsel %vm1212_vm4, %v4897_v29, %v3495_v41  ;;  %v881_v46 = vadd.f32 %v865_v56, %v738_v30  ;;  %v1149_v35 = vmul.f32 %v1133_v58, %v1083_v7  ;;  %v4898_v55 = vld [vmem:[#allocation47_spill] sm:$0xff] }
 0x218   : > { %v3695_v47 = vadd.f32 %v1442_v39, %v1316_v2  ;;  %v1471_v52 = vpop.permute.xlu1 %1470  ;;  %v1084_v24 = vsel %vm1070_vm3, %v4898_v55, %v3492_v6  ;;  %v1015_v62 = vmul.f32 %v999_v12, %v942_v1  ;;  %v1365_v41 = vsel %vm1354_vm5, %v3540_v42, %v3288_v45  ;;  %v4900_v2 = vld [vmem:[#allocation60_spill] sm:$0xff]  ;;  %v2452_v39 = vld [vmem:[#allocation5 + $0x48] ss:$0 sm:$0xff] }
 0x219   : > { %v1611_v20 = vpop.permute.xlu0 %1610  ;;  %v1510_v54 = vsel %vm1496_vm6, %v4899_v21, %v1471_v52  ;;  %v1023_v6 = vadd.f32 %v1007_v0, %v881_v46  ;;  %v1291_v56 = vmul.f32 %v1275_v10, %v1225_v32  ;;  %v1567_v12 = vmul.f32 %v1533_v15, %v3190_v22  ;;  %v4904_v0 = vld [vmem:[#allocation54_spill] sm:$0xff]  ;;  %v4942_v55 = vld [vmem:[#allocation84_spill] sm:$0xff] }
 0x21a   : > { %v1651_v30 = vsel %vm1638_vm7, %v4900_v2, %v1611_v20  ;;  %v3711_v58 = vmul.f32 %v1566_v50, %v1510_v54  ;;  %1486 = vrot.lane.b32.xlu1 %v3094_v8, %s2772_s23  ;;  %v889_v42 = vadd.f32 %v873_v23, %v746_v37  ;;  %v1157_v45 = vmul.f32 %v3580_v14, %v1084_v24  ;;  %v4907_v54 = vld [vmem:[#allocation58_spill] sm:$0xff]  ;;  %v4909_v2 = vld [vmem:[#allocation57_spill] sm:$0xff] }
 0x21b   : > { %v3715_v7 = vmul.f32 %v1700_v49, %v1651_v30  ;;  %1492 = vrot.lane.b32.xlu0 %v3084_v5, %s2772_s23  ;;  %v1701_v50 = vmul.f32 %v3655_v38, %v3204_v25  ;;  %v1568_v1 = vmul.f32 %v1537_v16, %v3190_v22  ;;  %v1165_v46 = vadd.f32 %v1149_v35, %v1023_v6  ;;  %v4903_v49 = vld [vmem:[#allocation51_spill] sm:$0xff]  ;;  %v4906_v35 = vld [vmem:[#allocation38_spill] sm:$0xff] }
 0x21c   : > { %4901 = vst [vmem:[#allocation13_spill] sm:$0xff] %v3711_v58  ;;  %v3724_v40 = vpop.permute.xlu1 %1478  ;;  %v1433_v10 = vmul.f32 %v1417_v44, %v1365_v41  ;;  %v1226_v15 = vsel %vm1212_vm4, %v4903_v49, %v3532_v27  ;;  %v1507_v23 = vsel %vm1496_vm6, %v1469_v43, %v4904_v0  ;;  %v1031_v14 = vadd.f32 %v1015_v62, %v889_v42  ;;  %v4905_v44 = vld [vmem:[#allocation20_spill] sm:$0xff]  ;;  %v4908_v62 = vld [vmem:[#allocation35_spill] sm:$0xff]  ;;  %v2453_v42 = vld [vmem:[#allocation5 + $0x50] ss:$0 sm:$0xff] }
 0x21d   : > { %4902 = vst [vmem:[#allocation23_spill] sm:$0xff] %v3715_v7  ;;  %v3733_v37 = vpop.permute.xlu0 %1618  ;;  %v1366_v16 = vsel %vm1354_vm5, %v3605_v3, %v3302_v48  ;;  %v1702_v24 = vmul.f32 %v3678_v36, %v3204_v25  ;;  %v1843_v27 = vmul.f32 %v2452_v39, %v4906_v35  ;;  %v1307_v32 = vadd.f32 %v1291_v56, %v1165_v46  ;;  %v4934_v7 = vld [vmem:[#allocation72_spill] sm:$0xff] }
 0x21e   : > { %1490 = vrot.lane.b32.xlu1 %v4905_v44, %s2772_s23  ;;  %v1649_v43 = vsel %vm1638_vm7, %v1611_v20, %v4907_v54  ;;  %v1708_v3 = vmul.f32 %v3632_v59, %v4908_v62  ;;  %v1173_v48 = vadd.f32 %v1157_v45, %v1031_v14  ;;  %v1299_v41 = vmul.f32 %v3610_v13, %v1226_v15  ;;  %v4911_v59 = vld [vmem:[#allocation63_spill] sm:$0xff]  ;;  %v4912_v15 = vld [vmem:[#allocation62_spill] sm:$0xff] }
 0x21f   : > { %1626 = vrot.lane.b32.xlu0 %v3082_v4, %s2773_s29  ;;  %v1575_v30 = vmul.f32 %v1559_v60, %v1507_v23  ;;  %v1505_v6 = vsel %vm1496_vm6, %v4904_v0, %v3661_v34  ;;  %v1449_v20 = vadd.f32 %v1433_v10, %v1307_v32  ;;  %v1441_v46 = vmul.f32 %v3638_v19, %v1366_v16  ;;  %v4914_v23 = vld [vmem:[#allocation61_spill] sm:$0xff] }
 0x220   : > { %v1613_v56 = vpop.permute.xlu1 %1612  ;;  %v1508_v21 = vsel %vm1496_vm6, %v1471_v52, %v4909_v2  ;;  %v1717_v60 = vmul.f32 %v1701_v50, %v1649_v43  ;;  %v1647_v45 = vsel %vm1638_vm7, %v4907_v54, %v3733_v37  ;;  %v3778_v52 = vld [vmem:[#allocation5 + $0x20] sm:$0xff]  ;;  %v1576_v0 = vmul.f32 %v3649_v51, %v1505_v6 }
 0x221   : > { %v3761_v58 = vpop.permute.xlu0 %1752  ;;  %v1652_v13 = vsel %vm1638_vm7, %v4911_v59, %v1613_v56  ;;  %v1709_v50 = vmul.f32 %v3655_v38, %v4908_v62  ;;  %v1650_v14 = vsel %vm1638_vm7, %v1613_v56, %v4914_v23  ;;  %v1844_v16 = vmul.f32 %v2453_v42, %v4906_v35 }
 0x222   : > { %4910 = vst [vmem:[#allocation15_spill] sm:$0xff] %v3761_v58  ;;  %v1791_v19 = vsel %vm1780_vm8, %v3761_v58, %v4912_v15  ;;  %v3774_v10 = vmul.f32 %v1708_v3, %v1652_v13  ;;  %1494 = vrot.lane.b32.xlu1 %v3096_v9, %s2772_s23  ;;  %v1315_v32 = vadd.f32 %v1299_v41, %v1173_v48  ;;  %s314_s23 = sand.u32 1, %s2751_s25  }
 0x223   : > { %1630 = vrot.lane.b32.xlu0 %v4895_v17, %s2773_s29  ;;  %v1591_v54 = vadd.f32 %v1575_v30, %v1449_v20  ;;  %v1583_v43 = vmul.f32 %v1567_v12, %v1508_v21  ;;  %v1859_v3 = vmul.f32 %v1843_v27, %v1791_v19  ;;  %v1718_v59 = vmul.f32 %v1702_v24, %v1647_v45  ;;  %v4915_v24 = vld [vmem:[#allocation37_spill] sm:$0xff]  ;;  %v4917_v19 = vld [vmem:[#allocation75_spill] sm:$0xff]  ;;  %s4623_s28 = scalar_lea.sflag [#allocation4], %s314_s23 }
 0x224   : > { %4913 = vst [vmem:[#allocation54_spill] sm:$0xff] %v3774_v10  ;;  %v3789_v13 = vpop.permute.xlu1 %1620  ;;  %v1506_v51 = vsel %vm1496_vm6, %v4909_v2, %v3724_v40  ;;  %v1710_v6 = vmul.f32 %v3678_v36, %v4908_v62  ;;  %v835_v56 = vrot.slane %v3778_v52, %v3341_v28  ;;  %v1457_v48 = vadd.f32 %v1441_v46, %v1315_v32  ;;  %v4932_v10 = vld [vmem:[#allocation66_spill] sm:$0xff] }
 0x225   : > { %v3795_v38 = vpop.permute.xlu0 %1760  ;;  %v1733_v41 = vadd.f32 %v1717_v60, %v1591_v54  ;;  %v1725_v21 = vmul.f32 %v1709_v50, %v1650_v14  ;;  %v1592_v2 = vadd.f32 %v1576_v0, %v3612_v61  ;;  %v1648_v36 = vsel %vm1638_vm7, %v4914_v23, %v3789_v13  ;;  %v4918_v61 = vld [vmem:[#allocation46_spill] sm:$0xff]  ;;  %v4919_v23 = vld [vmem:[#allocation65_spill] sm:$0xff] }
 0x226   : > { %v1789_v12 = vsel %vm1780_vm8, %v4912_v15, %v3795_v38  ;;  %1628 = vrot.lane.b32.xlu1 %v3094_v8, %s2773_s29  ;;  %v1851_v27 = vmul.f32 %v2452_v39, %v4915_v24  ;;  %v1852_v30 = vmul.f32 %v2453_v42, %v4915_v24  ;;  %v1599_v20 = vadd.f32 %v1583_v43, %v1457_v48  ;;  %v4920_v39 = vld [vmem:[#allocation24_spill] sm:$0xff] }
 0x227   : > { %1634 = vrot.lane.b32.xlu0 %v3084_v5, %s2773_s29  ;;  %v1584_v46 = vmul.f32 %v1568_v1, %v1506_v51  ;;  %v1875_v60 = vadd.f32 %v1859_v3, %v1733_v41  ;;  %v1860_v45 = vmul.f32 %v1844_v16, %v1789_v12  ;;  %v1079_v0 = vsel %vm1070_vm3, %v4918_v61, %v4917_v19  ;;  %v4922_v43 = vld [vmem:[#allocation68_spill] sm:$0xff]  ;;  %v4924_v51 = vld [vmem:[#allocation50_spill] sm:$0xff] }
 0x228   : > { %v3816_v15 = vpop.permute.xlu1 %1754  ;;  %v1734_v50 = vadd.f32 %v1718_v59, %v1592_v2  ;;  %v852_v32 = vmul.f32 %v835_v56, %v4920_v39  ;;  %v1741_v1 = vadd.f32 %v1725_v21, %v1599_v20  ;;  %v1726_v54 = vmul.f32 %v1710_v6, %v1648_v36  ;;  %v4923_v59 = vld [vmem:[#allocation79_spill] sm:$0xff]  ;;  %v4925_v41 = vld [vmem:[#allocation16_spill] sm:$0xff] }
 0x229   : > { %4916 = vst [vmem:[#allocation58_spill] sm:$0xff] %v3816_v15  ;;  %v1792_v14 = vsel %vm1780_vm8, %v3816_v15, %v4919_v23  ;;  %v3827_v42 = vpop.permute.xlu0 %769  ;;  %v1221_v48 = vsel %vm1212_vm4, %v4924_v51, %v4923_v59  ;;  %v741_v12 = vmul.f32 %v4893_v33, %v4925_v41  ;;  %v1399_v6 = vrot.slane %v3359_v57, %v3502_v31  ;;  %v4926_v61 = vld [vmem:[#allocation40_spill] sm:$0xff] }
 0x22a   : > { %4921 = vst [vmem:[#allocation57_spill] sm:$0xff] %v3827_v42  ;;  %v1867_v16 = vmul.f32 %v1851_v27, %v1792_v14  ;;  %v794_v3 = vsel %vm787_vm1, %v4922_v43, %v3827_v42  ;;  %1632 = vrot.lane.b32.xlu1 %v4905_v44, %s2773_s29  ;;  %v1600_v21 = vadd.f32 %v1584_v46, %v3695_v47  ;;  %v4927_v47 = vld [vmem:[#allocation29_spill] sm:$0xff]  ;;  %v4939_v42 = vld [vmem:[#allocation70_spill] sm:$0xff] }
 0x22b   : > { %v868_v2 = vmul.f32 %v852_v32, %v794_v3  ;;  %1768 = vrot.lane.b32.xlu0 %v3082_v4, %s2774_s8  ;;  %v1876_v36 = vadd.f32 %v1860_v45, %v1734_v50  ;;  %v1904_v14 = vadd.f32 %v4926_v61, %v1875_v60  ;;  %v1151_v43 = vmul.f32 %v3594_v63, %v1079_v0  ;;  %v4928_v46 = vld [vmem:[#allocation81_spill] sm:$0xff]  ;;  %v4929_v63 = vld [vmem:[#allocation39_spill] sm:$0xff] }
 0x22c   : > { %v1883_v27 = vadd.f32 %v1867_v16, %v1741_v1  ;;  %v3846_v20 = vpop.permute.xlu1 %1762  ;;  %v1277_v51 = vmul.f32 %v3584_v53, %v3170_v18  ;;  %v1143_v45 = vmul.f32 %v4928_v46, %v4927_v47  ;;  %v1742_v50 = vadd.f32 %v1726_v54, %v1600_v21  ;;  %v4930_v16 = vld [vmem:[#allocation32_spill] sm:$0xff] }
 0x22d   : > { %v884_v32 = vadd.f32 %v868_v2, %v741_v12  ;;  %v1790_v3 = vsel %vm1780_vm8, %v4919_v23, %v3846_v20  ;;  %v3856_v41 = vpop.permute.xlu0 %777  ;;  %v1419_v12 = vmul.f32 %v1399_v6, %v4930_v16  ;;  %v4931_v2 = vld [vmem:[#allocation25_spill] sm:$0xff]  ;;  %v977_v15 = vrot.slane %v3778_v52, %v4932_v10 }
 0x22e   : > { %v1868_v1 = vmul.f32 %v1852_v30, %v1790_v3  ;;  %1636 = vrot.lane.b32.xlu1 %v3096_v9, %s2773_s29  ;;  %v1912_v60 = vadd.f32 %v4929_v63, %v1883_v27  ;;  %v1293_v0 = vmul.f32 %v1277_v51, %v1221_v48  ;;  %v860_v23 = vmul.f32 %v835_v56, %v4931_v2  ;;  %v4935_v48 = vld [vmem:[#allocation78_spill] sm:$0xff]  ;;  %v4936_v51 = vld [vmem:[#allocation49_spill] sm:$0xff]  ;;  %v4938_v56 = vld [vmem:[#allocation19_spill] sm:$0xff]  ;;  %s2422_s29 = sshll.u32 %s314_s23, 7 }
 0x22f   : > { %1772 = vrot.lane.b32.xlu0 %v4895_v17, %s2774_s8  ;;  %v1905_v46 = vadd.f32 %v4926_v61, %v1876_v36  ;;  %v1920_v21 = vmax.f32 %v1904_v14, 0.0  ;;  %v1167_v27 = vadd.f32 %v1151_v43, %v4934_v7  ;;  %v1080_v49 = vsel %vm1070_vm3, %v4936_v51, %v4935_v48  ;;  %v4941_v51 = vld [vmem:[#allocation30_spill] sm:$0xff]  ;;  %v4943_v17 = vld [vmem:[#allocation52_spill] sm:$0xff] }
 0x230   : > { %v1884_v54 = vadd.f32 %v1868_v1, %v1742_v50  ;;  %v3870_v30 = vpop.permute.xlu1 %771  ;;  %v1928_v3 = vmax.f32 %v1912_v60, 0.0  ;;  %v749_v4 = vmul.f32 %v3136_v11, %v4938_v56  ;;  %v4940_v50 = vld [vmem:[#allocation85_spill] sm:$0xff]  ;;  %v1285_v56 = vmul.f32 %v3584_v53, %v4941_v51  ;;  %v1945_v53 = vld [vmem:[%s4670_s6] sm:$0xff] }
 0x231   : > { %4933 = vst [vmem:[#allocation62_spill] sm:$0xff] %v3870_v30  ;;  %v3877_v58 = vpop.permute.xlu0 %1338  ;;  %v795_v36 = vsel %vm787_vm1, %v4939_v42, %v3870_v30  ;;  %v1309_v60 = vadd.f32 %v1293_v0, %v1167_v27  ;;  %v1222_v42 = vsel %vm1212_vm4, %v4943_v17, %v4942_v55  ;;  %v1159_v30 = vmul.f32 %v1143_v45, %v1080_v49  ;;  %v4947_v27 = vld [vmem:[#allocation71_spill] sm:$0xff] }
 0x232   : > { %4937 = vst [vmem:[#allocation61_spill] sm:$0xff] %v3877_v58  ;;  %v1913_v14 = vadd.f32 %v4929_v63, %v1884_v54  ;;  %v1361_v7 = vsel %vm1354_vm5, %v4940_v50, %v3877_v58  ;;  %v876_v43 = vmul.f32 %v860_v23, %v795_v36  ;;  %1770 = vrot.lane.b32.xlu1 %v3094_v8, %s2774_s8  ;;  %v1921_v50 = vmax.f32 %v1905_v46, 0.0  ;;  %v4949_v46 = vld [vmem:[#allocation76_spill] sm:$0xff] }
 0x233   : > { %v2541_v1 = vpack.c.bf16 %v1928_v3, %v1920_v21  ;;  %v1435_v54 = vmul.f32 %v1419_v12, %v1361_v7  ;;  %1776 = vrot.lane.b32.xlu0 %v3084_v5, %s2774_s8  ;;  %v4945_v21 = vld [vmem:[#allocation26_spill] sm:$0xff]  ;;  %v1301_v12 = vmul.f32 %v1285_v56, %v1222_v42  ;;  %v4950_v7 = vld [vmem:[#allocation31_spill] sm:$0xff]  ;;  %v4952_v42 = vld [vmem:[#allocation88_spill] sm:$0xff] }
 0x234   : > { %v1929_v23 = vmax.f32 %v1913_v14, 0.0  ;;  %v892_v36 = vadd.f32 %v876_v43, %v749_v4  ;;  %v3900_v58 = vpop.permute.xlu1 %779  ;;  %v994_v3 = vmul.f32 %v977_v15, %v4945_v21  ;;  %v1175_v14 = vadd.f32 %v1159_v30, %v4949_v46  ;;  %v1946_v30 = vld [vmem:[%s4670_s6 + $0x8] sm:$0xff] }
 0x235   : > { %2542 = vmatprep.subr.bf16.mxu0 %v2541_v1  ;;  %4944 = vst [vmem:[#allocation75_spill] sm:$0xff] %v3900_v58  ;;  %v3905_v0 = vadd.f32 %v1435_v54, %v1309_v60  ;;  %v3908_v17 = vpop.permute.xlu0 %912  ;;  %v1427_v43 = vmul.f32 %v1399_v6, %v4950_v7  ;;  %v4965_v7 = vld [vmem:[#allocation83_spill] sm:$0xff] }
 0x236   : > { %4946 = vst [vmem:[#allocation46_spill] sm:$0xff] %v3908_v17  ;;  %v935_v49 = vsel %vm928_vm2, %v4947_v27, %v3908_v17  ;;  %1774 = vrot.lane.b32.xlu1 %v4905_v44, %s2774_s8  ;;  %v3916_v4 = vpack.c.bf16 %v1929_v23, %v1921_v50  ;;  %v1317_v27 = vadd.f32 %v1301_v12, %v1175_v14  ;;  %v4953_v50 = vld [vmem:[#allocation27_spill] sm:$0xff] }
 0x237   : > { %v1010_v45 = vmul.f32 %v994_v3, %v935_v49  ;;  %1949 = vperm.xlu0 %2631, %v1945_v53   ;;  %v4956_v3 = vld [vmem:[#allocation74_spill] sm:$0xff]  ;;  %v4957_v49 = vld [vmem:[#allocation69_spill] sm:$0xff]  ;;  %v1683_v44 = vrot.slane %v3359_v57, %v4965_v7 }
 0x238   : > { %4948 = vst [vmem:[#allocation65_spill] sm:$0xff] %v3916_v4  ;;  %v3920_v1 = vpop.permute.xlu1 %1340 }
 0x239   : > { %4951 = vst [vmem:[#allocation24_spill] sm:$0xff] %v3920_v1  ;;  %v1026_v60 = vadd.f32 %v1010_v45, %v884_v32  ;;  %v3922_v56 = vpop.permute.xlu0 %920  ;;  %v1362_v54 = vsel %vm1354_vm5, %v4952_v42, %v3920_v1  ;;  %v1002_v32 = vmul.f32 %v977_v15, %v4953_v50  ;;  %v1119_v45 = vrot.slane %v3778_v52, %v4957_v49 }
 0x23a   : > { %v1443_v8 = vmul.f32 %v1427_v43, %v1362_v54  ;;  %1778 = vrot.lane.b32.xlu1 %v3096_v9, %s2774_s8  ;;  %s4594_s8 = scalar_lea.vmem [#allocation7], %s2422_s29 }
 0x23b   : > { %s2318_s15 = sshll.u32 %s4594_s8, 4  ;;  %s4617_s15 = int_to_ptr.vmem [resolvable:$true] %s2318_s15 }
 0x23c   : > { %v3933_v6 = vadd.f32 %v1443_v8, %v1317_v27  ;;  %v3936_v23 = vpop.permute.xlu1 %914  ;;  %v4959_v8 = vld [vmem:[#allocation28_spill] sm:$0xff]  ;;  %s2689_s13 = scalar_lea.vmem %s4617_s15, 2048 }
 0x23d   : > { %4954 = vst [vmem:[#allocation68_spill] sm:$0xff] %v3936_v23  ;;  %v3938_v53 = vpop.permute.xlu0 %1480  ;;  %v936_v12 = vsel %vm928_vm2, %v4956_v3, %v3936_v23  ;;  %v1136_v42 = vmul.f32 %v1119_v45, %v4959_v8  ;;  %p2690_p10 = scmp.ne.s32.totalorder %s4617_s15, %s2689_s13 }
 0x23e   : > { %4955 = vst [vmem:[#allocation79_spill] sm:$0xff] %v3938_v53  ;;  %v1018_v46 = vmul.f32 %v1002_v32, %v936_v12  ;;  %1954 = vperm.xlu1 %2632, %v1946_v30   ;;  %v2451_v32 = vld [vmem:[#allocation5 + $0x40] ss:$0 sm:$0xff]  ;;  %v1144_v12 = vmul.f32 %v1119_v45, %v4927_v47 }
 0x23f   : > { %v4963_v30 = vld [vmem:[#allocation80_spill] sm:$0xff]  ;;  %v3977_v45 = vmul.f32 %v2451_v32, %v4906_v35  ;;  %p2691_p2 = pnand %p2690_p10, %p5066_p1 }
 0x240   : > { %v1034_v14 = vadd.f32 %v1018_v46, %v892_v36  ;;  %v3946_v43 = vpop.permute.xlu1 %922  ;;  %v1541_v36 = vrot.slane %v3359_v57, %v4963_v30  ;;  %v4971_v57 = vld [vmem:[#allocation34_spill] sm:$0xff] }
 0x241   : > { %4958 = vst [vmem:[#allocation50_spill] sm:$0xff] %v3946_v43  ;;  %v3949_v15 = vpop.permute.xlu0 %1054  ;;  %4969 = vst [vmem:[#allocation72_spill] sm:$0xff] %v3977_v45  ;;  %p2692_p3 = pneg %p2691_p2 }
 0x242   : > { %4960 = vst [vmem:[#allocation16_spill] sm:$0xff] %v3949_v15  ;;  %v1077_v54 = vsel %vm1070_vm3, %v4917_v19, %v3949_v15  ;;  %v3980_v15 = vmul.f32 %v2451_v32, %v4915_v24  ;;  %v1561_v7 = vmul.f32 %v1541_v36, %v4971_v57  ;;  %v1569_v30 = vmul.f32 %v1541_v36, %v3190_v22 }
 0x243   : > { %v1152_v27 = vmul.f32 %v1136_v42, %v1077_v54  ;;  %v1711_v32 = vmul.f32 %v1683_v44, %v4908_v62 }
 0x244   : > { %v3955_v1 = vpop.permute.xlu1 %1482  ;;  %4970 = vst [vmem:[#allocation78_spill] sm:$0xff] %v3980_v15 }
 0x245   : > { %4961 = vst [vmem:[#allocation29_spill] sm:$0xff] %v3955_v1  ;;  %v1168_v3 = vadd.f32 %v1152_v27, %v1026_v60  ;;  %v3957_v23 = vpop.permute.xlu0 %1062  ;;  %v4967_v60 = vld [vmem:[#allocation73_spill] sm:$0xff]  ;;  %v3974_v27 = vld [vmem:[#allocation5 + $0x38] sm:$0xff] }
 0x246   : > { %4962 = vst [vmem:[#allocation81_spill] sm:$0xff] %v3957_v23  ;;  %v1261_v42 = vrot.slane %v3778_v52, %v4967_v60  ;;  %4968 = vst [vmem:[#allocation66_spill] sm:$0xff] %v3974_v27  ;;  %v847_v57 = vrot.slane %v3974_v27, %v3341_v28  ;;  %v1131_v15 = vrot.slane %v3974_v27, %v4957_v49 }
 0x248   : > { %v3962_v46 = vpop.permute.xlu1 %1056  ;;  %v1286_v62 = vmul.f32 %v1261_v42, %v4941_v51  ;;  %v4031_v58 = vmul.f32 %v847_v57, %v4920_v39 }
 0x249   : > { %4964 = vst [vmem:[#allocation32_spill] sm:$0xff] %v3962_v46  ;;  %v3966_v17 = vpop.permute.xlu0 %1622  ;;  %v1078_v19 = vsel %vm1070_vm3, %v4935_v48, %v3962_v46  ;;  %v2454_v48 = vld [vmem:[#allocation5 + $0x58] ss:$0 sm:$0xff]  ;;  %v4973_v46 = vld [vmem:[#allocation77_spill] sm:$0xff] }
 0x24a   : > { %4966 = vst [vmem:[#allocation25_spill] sm:$0xff] %v3966_v17  ;;  %v1160_v54 = vmul.f32 %v1144_v12, %v1078_v19  ;;  %v819_v43 = vrot.slane %v4973_v46, %v3341_v28  ;;  %v1703_v12 = vmul.f32 %v1683_v44, %v3204_v25  ;;  %v1278_v19 = vmul.f32 %v1261_v42, %v3170_v18 }
 0x24b   : > { %v961_v36 = vrot.slane %v4973_v46, %v4932_v10  ;;  %v1103_v25 = vrot.slane %v4973_v46, %v4957_v49  ;;  %v1845_v44 = vmul.f32 %v2454_v48, %v4906_v35  ;;  %v1503_v42 = vsel %vm1496_vm6, %v3661_v34, %v3938_v53 }
 0x24c   : > { %v1176_v4 = vadd.f32 %v1160_v54, %v1034_v14  ;;  %v3984_v29 = vpop.permute.xlu1 %1064  ;;  %v989_v54 = vrot.slane %v3974_v27, %v4932_v10  ;;  %v4049_v34 = vmul.f32 %v847_v57, %v4931_v2  ;;  %v4056_v53 = vmul.f32 %v1131_v15, %v4959_v8 }
 0x24d   : > { %4972 = vst [vmem:[#allocation49_spill] sm:$0xff] %v3984_v29  ;;  %v3990_v23 = vpop.permute.xlu0 %1196  ;;  %v4018_v29 = vmul.f32 %v819_v43, %v4931_v2 }
 0x24e   : > { %4974 = vst [vmem:[#allocation19_spill] sm:$0xff] %v3990_v23  ;;  %v1219_v14 = vsel %vm1212_vm4, %v4923_v59, %v3990_v23  ;;  %v4012_v59 = vmul.f32 %v819_v43, %v4920_v39  ;;  %v4015_v23 = vmul.f32 %v2454_v48, %v4915_v24  ;;  %v1273_v48 = vrot.slane %v3974_v27, %v4967_v60  ;;  %v4035_v43 = vld [vmem:[#allocation5 + $0x28] sm:$0xff]  ;;  %v4037_v24 = vld [vmem:[#allocation5 + $0x30] sm:$0xff] }
 0x24f   : > { %v1294_v22 = vmul.f32 %v1278_v19, %v1219_v14  ;;  %4976 = vst [vmem:[#allocation85_spill] sm:$0xff] %v4018_v29  ;;  %v1245_v19 = vrot.slane %v4973_v46, %v4967_v60  ;;  %4979 = vst [vmem:[#allocation52_spill] sm:$0xff] %v4035_v43  ;;  %v4040_v46 = vmul.f32 %v961_v36, %v4945_v21 }
 0x250   : > { %v4009_v45 = vpop.permute.xlu1 %1624  ;;  %v4043_v29 = vmul.f32 %v989_v54, %v4945_v21  ;;  %v1577_v27 = vmul.f32 %v1561_v7, %v1503_v42  ;;  %v4087_v42 = vmul.f32 %v1103_v25, %v4927_v47 }
 0x251   : > { %4975 = vst [vmem:[#allocation70_spill] sm:$0xff] %v4009_v45  ;;  %v4026_v14 = vadd.f32 %v1294_v22, %v1168_v3  ;;  %v4028_v35 = vpop.permute.xlu0 %1204  ;;  %v4046_v22 = vmul.f32 %v1103_v25, %v4959_v8  ;;  %v1645_v3 = vsel %vm1638_vm7, %v3733_v37, %v3966_v17  ;;  %v4067_v57 = vmul.f32 %v1245_v19, %v3170_v18 }
 0x252   : > { %4978 = vst [vmem:[#allocation84_spill] sm:$0xff] %v4028_v35  ;;  %v4062_v35 = vmul.f32 %v989_v54, %v4953_v50  ;;  %v843_v37 = vrot.slane %v4037_v24, %v3341_v28  ;;  %v4084_v54 = vmul.f32 %v1273_v48, %v3170_v18  ;;  %4984 = vst [vmem:[#allocation27_spill] sm:$0xff] %v4087_v42 }
 0x253   : > { %4977 = vst [vmem:[#allocation30_spill] sm:$0xff] %v4026_v14  ;;  %4980 = vst [vmem:[#allocation26_spill] sm:$0xff] %v4046_v22  ;;  %v4059_v14 = vmul.f32 %v961_v36, %v4953_v50  ;;  %v839_v22 = vrot.slane %v4035_v43, %v3341_v28  ;;  %v1504_v36 = vsel %vm1496_vm6, %v3724_v40, %v3955_v1 }
 0x254   : > { %v4064_v9 = vpop.permute.xlu1 %1198  ;;  %4982 = vst [vmem:[#allocation76_spill] sm:$0xff] %v4067_v57  ;;  %v1719_v57 = vmul.f32 %v1703_v12, %v1645_v3  ;;  %v981_v1 = vrot.slane %v4035_v43, %v4932_v10  ;;  %v1123_v25 = vrot.slane %v4035_v43, %v4957_v49  ;;  %v1127_v12 = vrot.slane %v4037_v24, %v4957_v49 }
 0x255   : > { %4981 = vst [vmem:[#allocation71_spill] sm:$0xff] %v4064_v9  ;;  %v4077_v17 = vpop.permute.xlu0 %1764  ;;  %v1220_v7 = vsel %vm1212_vm4, %v4942_v55, %v4064_v9  ;;  %v1646_v55 = vsel %vm1638_vm7, %v3789_v13, %v4009_v45  ;;  %v985_v9 = vrot.slane %v4037_v24, %v4932_v10  ;;  %v4113_v13 = vmul.f32 %v839_v22, %v4920_v39 }
 0x256   : > { %4983 = vst [vmem:[#allocation88_spill] sm:$0xff] %v4077_v17  ;;  %v1787_v28 = vsel %vm1780_vm8, %v3795_v38, %v4077_v17  ;;  %v1302_v40 = vmul.f32 %v1286_v62, %v1220_v7  ;;  %v1593_v38 = vadd.f32 %v1577_v27, %v3905_v0  ;;  %v1585_v62 = vmul.f32 %v1569_v30, %v1504_v36 }
 0x257   : > { %v1861_v3 = vmul.f32 %v1845_v44, %v1787_v28  ;;  %v4116_v10 = vmul.f32 %v843_v37, %v4920_v39  ;;  %v4119_v45 = vmul.f32 %v1131_v15, %v4927_v47  ;;  %v4122_v49 = vmul.f32 %v1245_v19, %v4941_v51 }
 0x258   : > { %v4106_v7 = vadd.f32 %v1302_v40, %v1176_v4  ;;  %v4108_v17 = vpop.permute.xlu1 %1206  ;;  %v1735_v0 = vadd.f32 %v1719_v57, %v1593_v38  ;;  %v1727_v30 = vmul.f32 %v1711_v32, %v1646_v55  ;;  %v4125_v4 = vmul.f32 %v981_v1, %v4945_v21  ;;  %v4987_v55 = vld [vmem:[#allocation41_spill] sm:$0xff]  ;;  %v4988_v38 = vld [vmem:[#allocation12_spill] sm:$0xff] }
 0x259   : > { %v4110_v42 = vpop.permute.xlu0 %1346  ;;  %v4128_v27 = vmul.f32 %v1273_v48, %v4941_v51  ;;  %v4131_v44 = vmul.f32 %v985_v9, %v4945_v21  ;;  %v4134_v39 = vmul.f32 %v1123_v25, %v4959_v8  ;;  %v4137_v15 = vmul.f32 %v839_v22, %v4931_v2 }
 0x25a   : > { %4985 = vst [vmem:[#allocation74_spill] sm:$0xff] %v4106_v7  ;;  %v4140_v19 = vmul.f32 %v843_v37, %v4931_v2  ;;  %v1601_v32 = vadd.f32 %v1585_v62, %v3933_v6  ;;  %v1877_v57 = vadd.f32 %v1861_v3, %v1735_v0  ;;  %v4146_v48 = vmul.f32 %v1127_v12, %v4959_v8 }
 0x25b   : > { %v4150_v21 = vrot.slane %v4035_v43, %v4967_v60  ;;  %v4158_v2 = vrot.slane %v4037_v24, %v4967_v60  ;;  %v4161_v6 = vmul.f32 %v981_v1, %v4953_v50  ;;  %v4165_v8 = vrot.slane %v3778_v52, %v3502_v31 }
 0x25c   : > { %v4143_v36 = vpop.permute.xlu1 %1766  ;;  %v1743_v37 = vadd.f32 %v1727_v30, %v1601_v32  ;;  %v737_v1 = vmul.f32 %v4893_v33, %v4988_v38  ;;  %v744_v62 = vmul.f32 %v4893_v33, %v3084_v5 }
 0x25d   : > { %4986 = vst [vmem:[#allocation69_spill] sm:$0xff] %v4143_v36  ;;  %v782_v28 = vpop.permute.xlu0 %781  ;;  %v1788_v22 = vsel %vm1780_vm8, %v3846_v20, %v4143_v36  ;;  %v1906_v36 = vadd.f32 %v4926_v61, %v1877_v57  ;;  %v4192_v5 = vmul.f32 %v4150_v21, %v3170_v18 }
 0x25e   : > { %v788_v40 = vsel %vm787_vm1, %v3856_v41, %v782_v28  ;;  %v802_v20 = vsel %vm787_vm1, %v782_v28, %v4987_v55  ;;  %v1869_v60 = vmul.f32 %v4015_v23, %v1788_v22  ;;  %v4184_v28 = vmul.f32 %v985_v9, %v4953_v50  ;;  %v4990_v50 = vld [vmem:[#allocation43_spill] sm:$0xff] }
 0x25f   : > { %v864_v3 = vmul.f32 %v4012_v59, %v802_v20  ;;  %v871_v0 = vmul.f32 %v4031_v58, %v788_v40  ;;  %v4188_v23 = vrot.slane %v4035_v43, %v3502_v31  ;;  %v4196_v58 = vmul.f32 %v4158_v2, %v3170_v18 }
 0x260   : > { %v1885_v30 = vadd.f32 %v1869_v60, %v1743_v37  ;;  %v4180_v32 = vpop.permute.xlu1 %1348  ;;  %v4207_v37 = vmul.f32 %v1123_v25, %v4927_v47  ;;  %v4213_v18 = vmul.f32 %v4165_v8, %v4930_v16  ;;  %v4216_v60 = vmul.f32 %v1127_v12, %v4927_v47  ;;  %v4994_v47 = vld [vmem:[#allocation75_spill] sm:$0xff] }
 0x261   : > { %4989 = vst [vmem:[#allocation28_spill] sm:$0xff] %v4180_v32  ;;  %v880_v22 = vadd.f32 %v864_v3, %v737_v1  ;;  %v887_v55 = vadd.f32 %v871_v0, %v744_v62  ;;  %v925_v38 = vpop.permute.xlu0 %924  ;;  %v4992_v1 = vld [vmem:[#allocation14_spill] sm:$0xff]  ;;  %v1922_v25 = vmax.f32 %v1906_v36, 0.0 }
 0x262   : > { %v929_v9 = vsel %vm928_vm2, %v3922_v56, %v925_v38  ;;  %v943_v59 = vsel %vm928_vm2, %v925_v38, %v4990_v50  ;;  %v1914_v57 = vadd.f32 %v4929_v63, %v1885_v30  ;;  %4991 = vst [vmem:[#allocation73_spill] sm:$0xff] %v4216_v60  ;;  %v745_v62 = vmul.f32 %v3136_v11, %v4992_v1  ;;  %v4993_v3 = vld [vmem:[#allocation22_spill] sm:$0xff]  ;;  %v4996_v1 = vld [vmem:[#allocation81_spill] sm:$0xff]  ;;  %v1938_v60 = vld [vmem:[%s4225_s14 + $0x18] sm:$0xff] }
 0x263   : > { %v1006_v40 = vmul.f32 %v4040_v46, %v943_v59  ;;  %v1013_v20 = vmul.f32 %v4043_v29, %v929_v9  ;;  %v752_v0 = vmul.f32 %v3136_v11, %v4993_v3  ;;  %v4995_v50 = vld [vmem:[#allocation42_spill] sm:$0xff] }
 0x264   : > { %v784_v30 = vpop.permute.xlu1 %783  ;;  %v1930_v38 = vmax.f32 %v1914_v57, 0.0  ;;  %v4997_v57 = vld [vmem:[#allocation45_spill] sm:$0xff] }
 0x265   : > { %v1022_v29 = vadd.f32 %v1006_v40, %v880_v22  ;;  %v1029_v46 = vadd.f32 %v1013_v20, %v887_v55  ;;  %v1067_v9 = vpop.permute.xlu0 %1066  ;;  %v789_v12 = vsel %vm787_vm1, %v4994_v47, %v784_v30  ;;  %v803_v59 = vsel %vm787_vm1, %v784_v30, %v4995_v50  ;;  %v4998_v22 = vld [vmem:[#allocation85_spill] sm:$0xff]  ;;  %v4999_v20 = vld [vmem:[#allocation26_spill] sm:$0xff] }
 0x266   : > { %v1071_v36 = vsel %vm1070_vm3, %v4996_v1, %v1067_v9  ;;  %v1085_v3 = vsel %vm1070_vm3, %v1067_v9, %v4997_v57  ;;  %v872_v40 = vmul.f32 %v4998_v22, %v803_v59  ;;  %v879_v55 = vmul.f32 %v4049_v34, %v789_v12  ;;  %v5000_v59 = vld [vmem:[#allocation66_spill] sm:$0xff]  ;;  %v5003_v57 = vld [vmem:[#allocation84_spill] sm:$0xff] }
 0x267   : > { %v1148_v7 = vmul.f32 %v4999_v20, %v1085_v3  ;;  %v1155_v32 = vmul.f32 %v4056_v53, %v1071_v36  ;;  %v2545_v63 = vpack.c.bf16 %v1930_v38, %v1922_v25  ;;  %v4245_v30 = vmul.f32 %v4188_v23, %v4930_v16  ;;  %v5001_v38 = vld [vmem:[#allocation50_spill] sm:$0xff]  ;;  %v5004_v22 = vld [vmem:[#allocation48_spill] sm:$0xff] }
 0x268   : > { %v888_v50 = vadd.f32 %v872_v40, %v745_v62  ;;  %v895_v43 = vadd.f32 %v879_v55, %v752_v0  ;;  %v927_v61 = vpop.permute.xlu1 %926  ;;  %v4250_v9 = vrot.slane %v4037_v24, %v3502_v31  ;;  %v4254_v34 = vrot.slane %v5000_v59, %v3502_v31  ;;  %v5002_v0 = vld [vmem:[#allocation44_spill] sm:$0xff] }
 0x269   : > { %v1164_v12 = vadd.f32 %v1148_v7, %v1022_v29  ;;  %v1171_v53 = vadd.f32 %v1155_v32, %v1029_v46  ;;  %v1209_v25 = vpop.permute.xlu0 %1208  ;;  %2546 = vmatprep.subr.bf16.mxu1 %v2545_v63  ;;  %v930_v62 = vsel %vm928_vm2, %v5001_v38, %v927_v61  ;;  %v944_v36 = vsel %vm928_vm2, %v927_v61, %v5002_v0  ;;  %v5005_v32 = vld [vmem:[#allocation65_spill] sm:$0xff]  ;;  %v5006_v29 = vld [vmem:[#allocation76_spill] sm:$0xff]  ;;  %v1937_v61 = vld [vmem:[%s4225_s14 + $0x10] sm:$0xff] }
 0x26a   : > { %v1213_v3 = vsel %vm1212_vm4, %v5003_v57, %v1209_v25  ;;  %v1227_v31 = vsel %vm1212_vm4, %v1209_v25, %v5004_v22  ;;  %v1014_v7 = vmul.f32 %v4059_v14, %v944_v36  ;;  %v1021_v63 = vmul.f32 %v4062_v35, %v930_v62  ;;  %2548 = vmatpush1.bf16.msra.mxu1 %v5005_v32  ;;  %v5007_v0 = vld [vmem:[#allocation17_spill] sm:$0xff] }
 0x26b   : > { %v1290_v46 = vmul.f32 %v5006_v29, %v1227_v31  ;;  %v1297_v40 = vmul.f32 %v4084_v54, %v1213_v3  ;;  %2045 = vmatprep.subr.mxu1 %v1938_v60  ;;  %v4276_v55 = vmul.f32 %v4150_v21, %v4941_v51  ;;  %v4280_v20 = vmul.f32 %v4158_v2, %v4941_v51  ;;  %v4287_v54 = vld [vmem:[%s4669_s5] sm:$0xff]  ;;  %v5008_v3 = vld [vmem:[#allocation49_spill] sm:$0xff]  ;;  %v5009_v2 = vld [vmem:[#allocation47_spill] sm:$0xff] }
 0x26c   : > { %v1030_v25 = vadd.f32 %v1014_v7, %v888_v50  ;;  %v1037_v14 = vadd.f32 %v1021_v63, %v895_v43  ;;  %v743_v35 = vmul.f32 %v4893_v33, %v5007_v0  ;;  %v1069_v62 = vpop.permute.xlu1 %1068  ;;  %v5010_v22 = vld [vmem:[#allocation57_spill] sm:$0xff]  ;;  %v5012_v63 = vld [vmem:[#allocation82_spill] sm:$0xff] }
 0x26d   : > { %v1306_v60 = vadd.f32 %v1290_v46, %v1164_v12  ;;  %v4289_v36 = vadd.f32 %v1297_v40, %v1171_v53  ;;  %v774_v21 = vpop.permute.xlu0 %773  ;;  %v1072_v51 = vsel %vm1070_vm3, %v5008_v3, %v1069_v62  ;;  %v1086_v43 = vsel %vm1070_vm3, %v1069_v62, %v5009_v2  ;;  %v5011_v12 = vld [vmem:[#allocation27_spill] sm:$0xff]  ;;  %v5013_v29 = vld [vmem:[#allocation18_spill] sm:$0xff]  ;;  %v5015_v62 = vld [vmem:[#allocation64_spill] sm:$0xff] }
 0x26e   : > { %v790_v50 = vsel %vm787_vm1, %v774_v21, %v3856_v41  ;;  %v792_v31 = vsel %vm787_vm1, %v5010_v22, %v774_v21  ;;  %v1156_v53 = vmul.f32 %v5011_v12, %v1086_v43  ;;  %v1163_v7 = vmul.f32 %v4119_v45, %v1072_v51  ;;  %2046 = vmatpush1.msra.mxu1 %v1937_v61  ;;  %v5014_v41 = vld [vmem:[#allocation15_spill] sm:$0xff]  ;;  %v5019_v12 = vld [vmem:[#allocation46_spill] sm:$0xff] }
 0x26f   : > { %v1448_v32 = vadd.f32 %v5012_v63, %v1306_v60  ;;  %v742_v46 = vmul.f32 %v4893_v33, %v5013_v29  ;;  %v869_v40 = vmul.f32 %v4113_v13, %v792_v31  ;;  %v870_v0 = vmul.f32 %v4116_v10, %v790_v50  ;;  %2463 = vmatmul.mubr.msk.f32.vlgmr.msra.gmra.mrb[8].mxu1 %vm1957_vm9, %v4287_v54  ;;  %v4320_v33 = vld [vmem:[%s4669_s5 + $0x8] sm:$0xff]  ;;  %v5017_v13 = vld [vmem:[#allocation80_spill] sm:$0xff]  ;;  %v5018_v60 = vld [vmem:[#allocation87_spill] sm:$0xff] }
 0x270   : > { %v1793_v21 = vsel %vm1780_vm8, %v5015_v62, %v5014_v41  ;;  %v1172_v2 = vadd.f32 %v1156_v53, %v1030_v25  ;;  %v1179_v45 = vadd.f32 %v1163_v7, %v1037_v14  ;;  %v1211_v61 = vpop.permute.xlu1 %1210  ;;  %v5016_v51 = vmov 0.0   ;;  %v5020_v7 = vld [vmem:[#allocation51_spill] sm:$0xff] }
 0x271   : > { %2111 = vmatprep.mubr.f32.mxu1 %v5016_v51  ;;  %v4324_v10 = vrot.slane %v3778_v52, %v5017_v13  ;;  %v1590_v43 = vadd.f32 %v5018_v60, %v1448_v32  ;;  %v885_v50 = vadd.f32 %v869_v40, %v742_v46  ;;  %v886_v22 = vadd.f32 %v870_v0, %v743_v35  ;;  %v917_v31 = vpop.permute.xlu0 %916  ;;  %v5021_v35 = vld [vmem:[#allocation23_spill] sm:$0xff] }
 0x272   : > { %v1214_v25 = vsel %vm1212_vm4, %v4108_v17, %v1211_v61  ;;  %v931_v14 = vsel %vm928_vm2, %v917_v31, %v3922_v56  ;;  %v933_v53 = vsel %vm928_vm2, %v5019_v12, %v917_v31  ;;  %v1228_v63 = vsel %vm1212_vm4, %v1211_v61, %v5020_v7  ;;  %v5022_v56 = vld [vmem:[#allocation72_spill] sm:$0xff]  ;;  %v5026_v7 = vld [vmem:[#allocation62_spill] sm:$0xff] }
 0x273   : > { %v1305_v32 = vmul.f32 %v4128_v27, %v1214_v25  ;;  %v1732_v29 = vadd.f32 %v5021_v35, %v1590_v43  ;;  %v1011_v46 = vmul.f32 %v4125_v4, %v933_v53  ;;  %v1012_v40 = vmul.f32 %v4131_v44, %v931_v14  ;;  %2464 = vmatmul.mubr.msk.f32.gmra.mrb[10].mxu1 %vm1957_vm9, %v4320_v33  ;;  %v5023_v31 = vld [vmem:[#allocation20_spill] sm:$0xff]  ;;  %v5024_v27 = vld [vmem:[#allocation21_spill] sm:$0xff]  ;;  %v5028_v35 = vld [vmem:[#allocation58_spill] sm:$0xff] }
 0x274   : > { %v1298_v0 = vmul.f32 %v4122_v49, %v1228_v63  ;;  %v1858_v41 = vmul.f32 %v5022_v56, %v1793_v21  ;;  %v751_v61 = vmul.f32 %v3136_v11, %v5023_v31  ;;  %v776_v12 = vpop.permute.xlu1 %775  ;;  %v750_v43 = vmul.f32 %v3136_v11, %v5024_v27  ;;  %2259 = vmatprep.mubr.f32.mxu1 %v5016_v51  ;;  %v5030_v31 = vld [vmem:[#allocation31_spill] sm:$0xff] }
 0x275   : > { %v4347_v60 = vadd.f32 %v1305_v32, %v1179_v45  ;;  %v1027_v4 = vadd.f32 %v1011_v46, %v885_v50  ;;  %v1028_v44 = vadd.f32 %v1012_v40, %v886_v22  ;;  %v1059_v49 = vpop.permute.xlu0 %1058  ;;  %v791_v14 = vsel %vm787_vm1, %v776_v12, %v4994_v47  ;;  %v5025_v45 = vld [vmem:[#allocation16_spill] sm:$0xff] }
 0x276   : > { %v1314_v25 = vadd.f32 %v1298_v0, %v1172_v2  ;;  %v1073_v21 = vsel %vm1070_vm3, %v1059_v49, %v4996_v1  ;;  %v1075_v53 = vsel %vm1070_vm3, %v5025_v45, %v1059_v49  ;;  %v793_v11 = vsel %vm787_vm1, %v5026_v7, %v776_v12  ;;  %v5027_v2 = vld [vmem:[#allocation86_spill] sm:$0xff]  ;;  %v5029_v1 = vld [vmem:[#allocation67_spill] sm:$0xff] }
 0x277   : > { %v878_v50 = vmul.f32 %v4140_v19, %v791_v14  ;;  %v1153_v63 = vmul.f32 %v4134_v39, %v1075_v53  ;;  %v1154_v47 = vmul.f32 %v4146_v48, %v1073_v21  ;;  %v877_v32 = vmul.f32 %v4137_v15, %v793_v11  ;;  %v5031_v19 = vld [vmem:[#allocation13_spill] sm:$0xff]  ;;  %v5032_v14 = vld [vmem:[#allocation19_spill] sm:$0xff]  ;;  %v5035_v45 = vld [vmem:[#allocation78_spill] sm:$0xff] }
 0x278   : > { %v1456_v22 = vadd.f32 %v5027_v2, %v1314_v25  ;;  %v1794_v46 = vsel %vm1780_vm8, %v5029_v1, %v5028_v35  ;;  %v919_v0 = vpop.permute.xlu1 %918  ;;  %v1874_v56 = vadd.f32 %v1858_v41, %v1732_v29  ;;  %v4377_v12 = vmul.f32 %v4165_v8, %v5030_v31  ;;  %v5033_v8 = vld [vmem:[#allocation68_spill] sm:$0xff] }
 0x279   : > { %v894_v40 = vadd.f32 %v878_v50, %v751_v61  ;;  %v1169_v25 = vadd.f32 %v1153_v63, %v1027_v4  ;;  %v1170_v39 = vadd.f32 %v1154_v47, %v1028_v44  ;;  %v893_v49 = vadd.f32 %v877_v32, %v750_v43  ;;  %v1201_v48 = vpop.permute.xlu0 %1200  ;;  %v5034_v4 = vld [vmem:[#allocation54_spill] sm:$0xff]  ;;  %v5037_v35 = vld [vmem:[#allocation32_spill] sm:$0xff] }
 0x27a   : > { %v1598_v27 = vadd.f32 %v5031_v19, %v1456_v22  ;;  %v1215_v15 = vsel %vm1212_vm4, %v1201_v48, %v5003_v57  ;;  %v1217_v61 = vsel %vm1212_vm4, %v5032_v14, %v1201_v48  ;;  %v932_v29 = vsel %vm928_vm2, %v919_v0, %v5001_v38 }
 0x27b   : > { %v934_v41 = vsel %vm928_vm2, %v5033_v8, %v919_v0  ;;  %v1295_v43 = vmul.f32 %v4192_v5, %v1217_v61  ;;  %v1296_v21 = vmul.f32 %v4196_v58, %v1215_v15  ;;  %v1866_v53 = vmul.f32 %v5035_v45, %v1794_v46  ;;  %v5036_v58 = vld [vmem:[#allocation61_spill] sm:$0xff]  ;;  %v5040_v15 = vld [vmem:[#allocation52_spill] sm:$0xff]  ;;  %v5041_v61 = vld [vmem:[#allocation30_spill] sm:$0xff] }
 0x27c   : > { %v1740_v44 = vadd.f32 %v5034_v4, %v1598_v27  ;;  %v1019_v57 = vmul.f32 %v4161_v6, %v934_v41  ;;  %v1020_v7 = vmul.f32 %v4184_v28, %v932_v29  ;;  %v1061_v11 = vpop.permute.xlu1 %1060  ;;  %v1422_v38 = vmul.f32 %v4250_v9, %v4930_v16  ;;  %v5042_v4 = vld [vmem:[#allocation53_spill] sm:$0xff] }
 0x27d   : > { %v1423_v50 = vmul.f32 %v4254_v34, %v4930_v16  ;;  %v1311_v2 = vadd.f32 %v1295_v43, %v1169_v25  ;;  %v1312_v22 = vadd.f32 %v1296_v21, %v1170_v39  ;;  %v1343_v47 = vpop.permute.xlu0 %1342  ;;  %v1074_v5 = vsel %vm1070_vm3, %v1061_v11, %v5008_v3  ;;  %v5038_v3 = vld [vmem:[#allocation73_spill] sm:$0xff]  ;;  %v5039_v39 = vld [vmem:[#allocation40_spill] sm:$0xff] }
 0x27e   : > { %v1035_v63 = vadd.f32 %v1019_v57, %v893_v49  ;;  %v1036_v6 = vadd.f32 %v1020_v7, %v894_v40  ;;  %v1357_v28 = vsel %vm1354_vm5, %v1343_v47, %v4110_v42  ;;  %v1359_v32 = vsel %vm1354_vm5, %v5036_v58, %v1343_v47  ;;  %v5044_v7 = vld [vmem:[#allocation34_spill] sm:$0xff] }
 0x27f   : > { %v1076_v16 = vsel %vm1070_vm3, %v5037_v35, %v1061_v11  ;;  %v1436_v46 = vmul.f32 %v4213_v18, %v1359_v32  ;;  %v1437_v0 = vmul.f32 %v4245_v30, %v1357_v28  ;;  %v1162_v40 = vmul.f32 %v5038_v3, %v1074_v5  ;;  %v5045_v11 = vld [vmem:[#allocation39_spill] sm:$0xff]  ;;  %v5047_v32 = vld [vmem:[#allocation28_spill] sm:$0xff]  ;;  %v1936_v3 = vld [vmem:[%s4225_s14 + $0x8] sm:$0xff] }
 0x280   : > { %v1161_v19 = vmul.f32 %v4207_v37, %v1076_v16  ;;  %v1203_v27 = vpop.permute.xlu1 %1202  ;;  %v1882_v25 = vadd.f32 %v1866_v53, %v1740_v44  ;;  %v1903_v49 = vadd.f32 %v5039_v39, %v1874_v56  ;;  %v1429_v48 = vmul.f32 %v4188_v23, %v5030_v31  ;;  %v5043_v44 = vld [vmem:[#allocation71_spill] sm:$0xff]  ;;  %v5048_v16 = vld [vmem:[#allocation24_spill] sm:$0xff] }
 0x281   : > { %v4423_v14 = vrot.slane %v5040_v15, %v5017_v13  ;;  %v1452_v29 = vadd.f32 %v1436_v46, %v5041_v61  ;;  %v1453_v18 = vadd.f32 %v1437_v0, %v1311_v2  ;;  %v1178_v30 = vadd.f32 %v1162_v40, %v1036_v6  ;;  %v1351_v41 = vpop.permute.xlu0 %1350 }
 0x282   : > { %v1177_v8 = vadd.f32 %v1161_v19, %v1035_v63  ;;  %v1355_v37 = vsel %vm1354_vm5, %v4110_v42, %v1351_v41  ;;  %v1369_v56 = vsel %vm1354_vm5, %v1351_v41, %v5042_v4  ;;  %v1216_v23 = vsel %vm1212_vm4, %v1203_v27, %v4108_v17  ;;  %v5050_v41 = vld [vmem:[#allocation55_spill] sm:$0xff] }
 0x283   : > { %v1218_v43 = vsel %vm1212_vm4, %v5043_v44, %v1203_v27  ;;  %v1438_v21 = vmul.f32 %v1422_v38, %v1355_v37  ;;  %v1439_v57 = vmul.f32 %v1423_v50, %v1369_v56  ;;  %v1304_v53 = vmul.f32 %v4280_v20, %v1216_v23 }
 0x284   : > { %v1303_v45 = vmul.f32 %v4276_v55, %v1218_v43  ;;  %v1562_v42 = vmul.f32 %v4324_v10, %v5044_v7  ;;  %v1911_v2 = vadd.f32 %v5045_v11, %v1882_v25  ;;  %v1919_v63 = vmax.f32 %v1903_v49, 0.0  ;;  %v1345_v47 = vpop.permute.xlu1 %1344  ;;  %v5046_v55 = vld [vmem:[#allocation79_spill] sm:$0xff]  ;;  %v5051_v43 = vld [vmem:[#allocation33_spill] sm:$0xff] }
 0x285   : > { %v1430_v17 = vmul.f32 %v4250_v9, %v5030_v31  ;;  %v1454_v5 = vadd.f32 %v1438_v21, %v1312_v22  ;;  %v1455_v6 = vadd.f32 %v1439_v57, %v4289_v36  ;;  %v1320_v50 = vadd.f32 %v1304_v53, %v1178_v30  ;;  %v1485_v28 = vpop.permute.xlu0 %1484 }
 0x286   : > { %v1319_v38 = vadd.f32 %v1303_v45, %v1177_v8  ;;  %v1501_v20 = vsel %vm1496_vm6, %v5046_v55, %v1485_v28  ;;  %v1927_v58 = vmax.f32 %v1911_v2, 0.0  ;;  %v1358_v35 = vsel %vm1354_vm5, %v1345_v47, %v5047_v32  ;;  %v5049_v8 = vld [vmem:[#allocation74_spill] sm:$0xff]  ;;  %v5052_v45 = vld [vmem:[#allocation83_spill] sm:$0xff] }
 0x287   : > { %v1360_v46 = vsel %vm1354_vm5, %v5048_v16, %v1345_v47  ;;  %v1578_v9 = vmul.f32 %v1562_v42, %v1501_v20  ;;  %v1445_v36 = vmul.f32 %v1429_v48, %v1358_v35  ;;  %v1431_v0 = vmul.f32 %v4254_v34, %v5030_v31  ;;  %v5055_v16 = vld [vmem:[#allocation36_spill] sm:$0xff] }
 0x288   : > { %v1444_v22 = vmul.f32 %v4377_v12, %v1360_v46  ;;  %v2543_v19 = vpack.c.bf16 %v1927_v58, %v1919_v63  ;;  %v1563_v40 = vmul.f32 %v4423_v14, %v5044_v7  ;;  %v1353_v27 = vpop.permute.xlu1 %1352  ;;  %v1553_v25 = vrot.slane %v4037_v24, %v5017_v13 }
 0x289   : > { %v1557_v49 = vrot.slane %v5000_v59, %v5017_v13  ;;  %v1594_v61 = vadd.f32 %v1578_v9, %v1452_v29  ;;  %v1461_v48 = vadd.f32 %v1445_v36, %v1319_v38  ;;  %v1489_v30 = vpop.permute.xlu0 %1488  ;;  %v1356_v34 = vsel %vm1354_vm5, %v5047_v32, %v1353_v27  ;;  %v1935_v29 = vld [vmem:[%s4225_s14] sm:$0xff]  ;;  %v5056_v36 = vld [vmem:[#allocation25_spill] sm:$0xff] }
 0x28a   : > { %v1460_v12 = vadd.f32 %v1444_v22, %v5049_v8  ;;  %2544 = vmatpush1.bf16.msra.mxu0 %v2543_v19  ;;  %v1499_v31 = vsel %vm1496_vm6, %v1485_v28, %v1489_v30  ;;  %v1370_v37 = vsel %vm1354_vm5, %v1353_v27, %v5050_v41  ;;  %v1446_v4 = vmul.f32 %v1430_v17, %v1356_v34  ;;  %v5053_v17 = vld [vmem:[#allocation29_spill] sm:$0xff]  ;;  %v5054_v28 = vld [vmem:[#allocation56_spill] sm:$0xff]  ;;  %v5057_v34 = vld [vmem:[#allocation59_spill] sm:$0xff] }
 0x28b   : > { %1968 = vmatprep.subr.mxu0 %v1936_v3  ;;  %v1579_v13 = vmul.f32 %v1563_v40, %v1499_v31  ;;  %v1447_v56 = vmul.f32 %v1431_v0, %v1370_v37  ;;  %v1564_v44 = vmul.f32 %v1553_v25, %v5044_v7  ;;  %v1570_v21 = vmul.f32 %v4324_v10, %v5051_v43 }
 0x28c   : > { %v1462_v23 = vadd.f32 %v1446_v4, %v1320_v50  ;;  %v1487_v57 = vpop.permute.xlu1 %1486  ;;  %v1687_v53 = vrot.slane %v3778_v52, %v5052_v45  ;;  %v1565_v63 = vmul.f32 %v1557_v49, %v5044_v7  ;;  %v1571_v7 = vmul.f32 %v4423_v14, %v5051_v43 }
 0x28d   : > { %v1595_v42 = vadd.f32 %v1579_v13, %v1453_v18  ;;  %v1463_v2 = vadd.f32 %v1447_v56, %v4347_v60  ;;  %v1493_v47 = vpop.permute.xlu0 %1492  ;;  %v1502_v38 = vsel %vm1496_vm6, %v5053_v17, %v1487_v57  ;;  %v1691_v58 = vrot.slane %v5040_v15, %v5052_v45 }
 0x28e   : > { %1969 = vmatpush1.msra.mxu0 %v1935_v29  ;;  %v1497_v50 = vsel %vm1496_vm6, %v1489_v30, %v1493_v47  ;;  %v1511_v10 = vsel %vm1496_vm6, %v1493_v47, %v5054_v28  ;;  %v1586_v55 = vmul.f32 %v1570_v21, %v1502_v38  ;;  %v1704_v46 = vmul.f32 %v1687_v53, %v5055_v16 }
 0x28f   : > { %2461 = vmatmul.mubr.msk.f32.vlgmr.msra.gmra.mrb[8].mxu0 %vm1957_vm9, %v4287_v54  ;;  %v1580_v52 = vmul.f32 %v1564_v44, %v1497_v50  ;;  %v1581_v60 = vmul.f32 %v1565_v63, %v1511_v10  ;;  %v1572_v3 = vmul.f32 %v1553_v25, %v5051_v43  ;;  %v1695_v27 = vrot.slane %v4037_v24, %v5052_v45  ;;  %v5060_v63 = vld [vmem:[#allocation60_spill] sm:$0xff] }
 0x290   : > { %2034 = vmatprep.mubr.f32.mxu0 %v5016_v51  ;;  %v1602_v18 = vadd.f32 %v1586_v55, %v1460_v12  ;;  %v1491_v20 = vpop.permute.xlu1 %1490 }
 0x291   : > { %v1596_v32 = vadd.f32 %v1580_v52, %v1454_v5  ;;  %v1597_v35 = vadd.f32 %v1581_v60, %v1455_v6  ;;  %v1627_v9 = vpop.permute.xlu0 %1626  ;;  %v1500_v22 = vsel %vm1496_vm6, %v1487_v57, %v1491_v20  ;;  %v1705_v5 = vmul.f32 %v1691_v58, %v5055_v16  ;;  %v5059_v57 = vld [vmem:[#allocation70_spill] sm:$0xff] }
 0x292   : > { %v1643_v0 = vsel %vm1638_vm7, %v5056_v36, %v1627_v9  ;;  %v1587_v19 = vmul.f32 %v1571_v7, %v1500_v22  ;;  %v1573_v6 = vmul.f32 %v1557_v49, %v5051_v43  ;;  %v1706_v44 = vmul.f32 %v1695_v27, %v5055_v16  ;;  %v5061_v60 = vld [vmem:[#allocation38_spill] sm:$0xff] }
 0x293   : > { %2462 = vmatmul.mubr.msk.f32.gmra.mrb[10].mxu0 %vm1957_vm9, %v4320_v33  ;;  %v1720_v14 = vmul.f32 %v1704_v46, %v1643_v0 }
 0x294   : > { %v1603_v15 = vadd.f32 %v1587_v19, %v1461_v48  ;;  %v1495_v40 = vpop.permute.xlu1 %1494  ;;  %2182 = vmatprep.mubr.f32.mxu0 %v5016_v51  ;;  %v1699_v48 = vrot.slane %v5000_v59, %v5052_v45 }
 0x295   : > { %v1736_v8 = vadd.f32 %v1720_v14, %v1594_v61  ;;  %v1631_v12 = vpop.permute.xlu0 %1630  ;;  %v1498_v30 = vsel %vm1496_vm6, %v1491_v20, %v1495_v40  ;;  %v1512_v25 = vsel %vm1496_vm6, %v1495_v40, %v5057_v34  ;;  %v5058_v61 = vld [vmem:[#allocation35_spill] sm:$0xff]  ;;  %v5062_v20 = vld [vmem:[#allocation88_spill] sm:$0xff]  ;;  %v2457_v40 = vld [vmem:[#allocation5 + $0x70] ss:$0 sm:$0xff] }
 0x296   : > { %v1641_v49 = vsel %vm1638_vm7, %v1627_v9, %v1631_v12  ;;  %v1588_v31 = vmul.f32 %v1572_v3, %v1498_v30  ;;  %v1589_v41 = vmul.f32 %v1573_v6, %v1512_v25  ;;  %v1712_v13 = vmul.f32 %v1687_v53, %v5058_v61  ;;  %v2456_v9 = vld [vmem:[#allocation5 + $0x68] ss:$0 sm:$0xff]  ;;  %v5063_v14 = vld [vmem:[#allocation63_spill] sm:$0xff] }
 0x297   : > { %v1721_v24 = vmul.f32 %v1705_v5, %v1641_v49  ;;  %v1707_v43 = vmul.f32 %v1699_v48, %v5055_v16  ;;  %v1713_v38 = vmul.f32 %v1691_v58, %v5058_v61  ;;  %v1715_v58 = vmul.f32 %v1699_v48, %v5058_v61  ;;  %v5064_v48 = vld [vmem:[#allocation37_spill] sm:$0xff] }
 0x298   : > { %v1604_v37 = vadd.f32 %v1588_v31, %v1462_v23  ;;  %v1605_v4 = vadd.f32 %v1589_v41, %v1463_v2  ;;  %v1629_v29 = vpop.permute.xlu1 %1628  ;;  %v1848_v41 = vmul.f32 %v2457_v40, %v5061_v60 }
 0x299   : > { %v1737_v56 = vadd.f32 %v1721_v24, %v1595_v42  ;;  %v1635_v21 = vpop.permute.xlu0 %1634  ;;  %v1644_v59 = vsel %vm1638_vm7, %v5059_v57, %v1629_v29  ;;  %v2455_v42 = vld [vmem:[#allocation5 + $0x60] ss:$0 sm:$0xff] }
 0x29a   : > { %v1639_v45 = vsel %vm1638_vm7, %v1631_v12, %v1635_v21  ;;  %v1653_v23 = vsel %vm1638_vm7, %v1635_v21, %v5060_v63  ;;  %v1728_v2 = vmul.f32 %v1712_v13, %v1644_v59  ;;  %v1846_v7 = vmul.f32 %v2455_v42, %v5061_v60  ;;  %v2458_v12 = vld [vmem:[#allocation5 + $0x78] ss:$0 sm:$0xff] }
 0x29b   : > { %v1722_v53 = vmul.f32 %v1706_v44, %v1639_v45  ;;  %v1723_v47 = vmul.f32 %v1707_v43, %v1653_v23  ;;  %v1854_v49 = vmul.f32 %v2455_v42, %v5064_v48  ;;  %v1855_v45 = vmul.f32 %v2456_v9, %v5064_v48 }
 0x29c   : > { %v1744_v17 = vadd.f32 %v1728_v2, %v1602_v18  ;;  %v1633_v50 = vpop.permute.xlu1 %1632  ;;  %v1714_v18 = vmul.f32 %v1695_v27, %v5058_v61  ;;  %v5065_v61 = vld [vmem:[#allocation69_spill] sm:$0xff]  ;;  %v1856_v42 = vmul.f32 %v2457_v40, %v5064_v48 }
 0x29d   : > { %v1738_v28 = vadd.f32 %v1722_v53, %v1596_v32  ;;  %v1739_v10 = vadd.f32 %v1723_v47, %v1597_v35  ;;  %v1769_v55 = vpop.permute.xlu0 %1768  ;;  %v1642_v52 = vsel %vm1638_vm7, %v1629_v29, %v1633_v50  ;;  %v1847_v35 = vmul.f32 %v2456_v9, %v5061_v60 }
 0x29e   : > { %v1785_v16 = vsel %vm1780_vm8, %v5062_v20, %v1769_v55  ;;  %v1729_v46 = vmul.f32 %v1713_v38, %v1642_v52  ;;  %v1849_v29 = vmul.f32 %v2458_v12, %v5061_v60 }
 0x29f   : > { %v1862_v22 = vmul.f32 %v1846_v7, %v1785_v16 }
 0x2a0   : > { %v1745_v36 = vadd.f32 %v1729_v46, %v1603_v15  ;;  %v1637_v32 = vpop.permute.xlu1 %1636 }
 0x2a1   : > { %v1773_v0 = vpop.permute.xlu0 %1772  ;;  %v1640_v19 = vsel %vm1638_vm7, %v1633_v50, %v1637_v32  ;;  %v1654_v3 = vsel %vm1638_vm7, %v1637_v32, %v5063_v14  ;;  %v1878_v30 = vadd.f32 %v1862_v22, %v1736_v8 }
 0x2a2   : > { %v1783_v5 = vsel %vm1780_vm8, %v1769_v55, %v1773_v0  ;;  %v1730_v6 = vmul.f32 %v1714_v18, %v1640_v19  ;;  %v1731_v15 = vmul.f32 %v1715_v58, %v1654_v3 }
 0x2a3   : > { %v1863_v27 = vmul.f32 %v1847_v35, %v1783_v5  ;;  %v1907_v21 = vadd.f32 %v5039_v39, %v1878_v30 }
 0x2a4   : > { %v1746_v34 = vadd.f32 %v1730_v6, %v1604_v37  ;;  %v1747_v25 = vadd.f32 %v1731_v15, %v1605_v4  ;;  %v1771_v31 = vpop.permute.xlu1 %1770  ;;  %v1939_v6 = vld [vmem:[%s4225_s14 + $0x20] sm:$0xff] }
 0x2a5   : > { %v1777_v24 = vpop.permute.xlu0 %1776  ;;  %v1786_v13 = vsel %vm1780_vm8, %v5065_v61, %v1771_v31  ;;  %v1879_v4 = vadd.f32 %v1863_v27, %v1737_v56  ;;  %v1923_v38 = vmax.f32 %v1907_v21, 0.0 }
 0x2a6   : > { %v1781_v44 = vsel %vm1780_vm8, %v1773_v0, %v1777_v24  ;;  %v1795_v8 = vsel %vm1780_vm8, %v1777_v24, %v5015_v62  ;;  %v1870_v37 = vmul.f32 %v1854_v49, %v1786_v13  ;;  %v1857_v62 = vmul.f32 %v2458_v12, %v5064_v48 }
 0x2a7   : > { %v1864_v43 = vmul.f32 %v1848_v41, %v1781_v44  ;;  %v1865_v57 = vmul.f32 %v1849_v29, %v1795_v8  ;;  %v1908_v56 = vadd.f32 %v5039_v39, %v1879_v4 }
 0x2a8   : > { %v1886_v59 = vadd.f32 %v1870_v37, %v1744_v17  ;;  %v1775_v63 = vpop.permute.xlu1 %1774 }
 0x2a9   : > { %v1784_v23 = vsel %vm1780_vm8, %v1771_v31, %v1775_v63  ;;  %v1880_v47 = vadd.f32 %v1864_v43, %v1738_v28  ;;  %v1881_v50 = vadd.f32 %v1865_v57, %v1739_v10  ;;  %v1924_v22 = vmax.f32 %v1908_v56, 0.0 }
 0x2aa   : > { %v1915_v2 = vadd.f32 %v5045_v11, %v1886_v59  ;;  %v1871_v53 = vmul.f32 %v1855_v45, %v1784_v23 }
 0x2ab   : > { %v1909_v9 = vadd.f32 %v5039_v39, %v1880_v47  ;;  %v1910_v58 = vadd.f32 %v5039_v39, %v1881_v50  ;;  %v1942_v39 = vld [vmem:[%s4225_s14 + $0x38] sm:$0xff] }
 0x2ac   : > { %v1931_v55 = vmax.f32 %v1915_v2, 0.0  ;;  %v1887_v17 = vadd.f32 %v1871_v53, %v1745_v36  ;;  %v1779_v52 = vpop.permute.xlu1 %1778 }
 0x2ad   : > { %v1782_v60 = vsel %vm1780_vm8, %v1775_v63, %v1779_v52  ;;  %v1796_v7 = vsel %vm1780_vm8, %v1779_v52, %v5029_v1  ;;  %v1940_v1 = vld [vmem:[%s4225_s14 + $0x28] sm:$0xff]  ;;  %v1925_v0 = vmax.f32 %v1909_v9, 0.0  ;;  %v1926_v14 = vmax.f32 %v1910_v58, 0.0 }
 0x2ae   : > { %v1872_v28 = vmul.f32 %v1856_v42, %v1782_v60  ;;  %v1873_v20 = vmul.f32 %v1857_v62, %v1796_v7  ;;  %v1916_v16 = vadd.f32 %v5045_v11, %v1887_v17  ;;  %v2551_v46 = vpack.c.bf16 %v1931_v55, %v1923_v38 }
 0x2b0   : > { %v1888_v10 = vadd.f32 %v1872_v28, %v1746_v34  ;;  %v1889_v36 = vadd.f32 %v1873_v20, %v1747_v25  ;;  %v1932_v18 = vmax.f32 %v1916_v16, 0.0 }
 0x2b2   : > { %v1917_v32 = vadd.f32 %v5045_v11, %v1888_v10  ;;  %v2549_v35 = vpack.c.bf16 %v1932_v18, %v1924_v22  ;;  %v1918_v26 = vadd.f32 %v5045_v11, %v1889_v36  ;;  %v1941_v11 = vld [vmem:[%s4225_s14 + $0x30] sm:$0xff]  ;;  %s2693_s14 = sshll.u32 %s2775_s18, 4  ;;  %s2694_s14 = int_to_ptr.vmem [resolvable:$false] %s2693_s14 }
 0x2b3   : > { %s2695_s17 = scalar_lea.vmem %s2694_s14, 4096  ;;  %p2696_p4 = scmp.lt.s32.totalorder %s4617_s15, %s2694_s14 }
 0x2b4   : > { %v1933_v19 = vmax.f32 %v1917_v32, 0.0  ;;  %2550 = vmatprep.subr.bf16.mxu0 %v2549_v35  ;;  %v1934_v3 = vmax.f32 %v1918_v26, 0.0  ;;  %p2697_p7 = scmp.lt.s32.totalorder %s2695_s17, %s2689_s13 }
 0x2b5   : > { %2552 = vmatpush1.bf16.msra.mxu0 %v2551_v46 }
 0x2b6   : > { %2122 = vmatprep.subr.mxu0 %v1940_v1  ;;  %v2553_v5 = vpack.c.bf16 %v1934_v3, %v1926_v14  ;;  %v2555_v15 = vpack.c.bf16 %v1933_v19, %v1925_v0  ;;  %v1950_v40 = vpop.permute.xlu0 %1949  ;;  %p2698_p8 = por %p2697_p7, %p2696_p4 }
 0x2b8   : > { %2554 = vmatprep.subr.bf16.mxu1 %v2553_v5  ;;  %p2699_p11 = pnand %p2698_p8, %p2692_p3 }
 0x2b9   : > { %2123 = vmatpush1.msra.mxu0 %v1939_v6  ;;  %2556 = vmatpush1.bf16.msra.mxu1 %v2555_v15 }
 0x2ba   : > { %2465 = vmatmul.mubr.msk.f32.vlgmr.msra.gmra.mrb[12].mxu0 %vm1957_vm9, %v4287_v54  ;;  %2199 = vmatprep.subr.mxu1 %v1942_v39 }
 0x2bb   : > { %2188 = vmatprep.mubr.f32.mxu0 %v5016_v51 }
 0x2bd   : > { %2200 = vmatpush1.msra.mxu1 %v1941_v11  ;;  %v1955_v48 = vpop.permute.xlu1 %1954 }
 0x2be   : > { %2466 = vmatmul.mubr.msk.f32.gmra.mrb[14].mxu0 %vm1957_vm9, %v4320_v33  ;;  %2467 = vmatmul.mubr.msk.f32.vlgmr.msra.gmra.mrb[12].mxu1 %vm1957_vm9, %v4287_v54 }
 0x2bf   : > { %2265 = vmatprep.mubr.f32.mxu1 %v5016_v51 }
 0x2c2   : > { %2468 = vmatmul.mubr.msk.f32.gmra.mrb[14].mxu1 %vm1957_vm9, %v4320_v33 }
 0x342   : > { %v2107_v27 = vpop.f32.mrb[8].mxu1 }
 0x343   : > { %v2108_v12 = vadd.f32 %v2107_v27, %v1950_v40  ;;  %v2109_v30 = vpop.f32.mrb[9].mxu1 }
 0x344   : > { %v2110_v34 = vadd.f32 %v2109_v30, %v1950_v40 }
 0x345   : > { %v2274_v25 = vmax.f32 %v2108_v12, 0.0 }
 0x346   : > { %v2275_v49 = vmax.f32 %v2110_v34, 0.0  ;;  %v2113_v31 = vpop.f32.mrb[10].mxu1 }
 0x347   : > { %2290 = vst [vmem:[%s4594_s8 + $0x10] sm:$0xff] %v2274_v25  ;;  %v2114_v54 = vadd.f32 %v2113_v31, %v1955_v48  ;;  %v2115_v51 = vpop.f32.mrb[11].mxu1 }
 0x348   : > { %2291 = vst [vmem:[%s4594_s8 + $0x18] sm:$0xff] %v2275_v49  ;;  %v2116_v33 = vadd.f32 %v2115_v51, %v1955_v48 }
 0x349   : > { %v2282_v41 = vmax.f32 %v2114_v54, 0.0 }
 0x34a   : > { %v2283_v24 = vmax.f32 %v2116_v33, 0.0 }
 0x34b   : > { %2298 = vst [vmem:[%s4594_s8 + $0x50] sm:$0xff] %v2282_v41 }
 0x34c   : > { %2299 = vst [vmem:[%s4594_s8 + $0x58] sm:$0xff] %v2283_v24 }
 0x362   : > { %v2030_v61 = vpop.f32.mrb[8].mxu0 }
 0x363   : > { %v2031_v13 = vadd.f32 %v2030_v61, %v1950_v40  ;;  %v2032_v29 = vpop.f32.mrb[9].mxu0 }
 0x364   : > { %v2033_v44 = vadd.f32 %v2032_v29, %v1950_v40 }
 0x365   : > { %v2272_v8 = vmax.f32 %v2031_v13, 0.0 }
 0x366   : > { %v2273_v37 = vmax.f32 %v2033_v44, 0.0  ;;  %v2036_v4 = vpop.f32.mrb[10].mxu0 }
 0x367   : > { %2288 = vst [vmem:[%s4594_s8] sm:$0xff] %v2272_v8  ;;  %v2037_v43 = vadd.f32 %v2036_v4, %v1955_v48  ;;  %v2038_v21 = vpop.f32.mrb[11].mxu0 }
 0x368   : > { %2289 = vst [vmem:[%s4594_s8 + $0x8] sm:$0xff] %v2273_v37  ;;  %v2039_v57 = vadd.f32 %v2038_v21, %v1955_v48 }
 0x369   : > { %v2280_v59 = vmax.f32 %v2037_v43, 0.0 }
 0x36a   : > { %v2281_v45 = vmax.f32 %v2039_v57, 0.0 }
 0x36b   : > { %2296 = vst [vmem:[%s4594_s8 + $0x40] sm:$0xff] %v2280_v59 }
 0x36c   : > { %2297 = vst [vmem:[%s4594_s8 + $0x48] sm:$0xff] %v2281_v45 }
 0x38d   : > { %v2184_v63 = vpop.f32.mrb[12].mxu0 }
 0x38e   : > { %v2185_v23 = vadd.f32 %v2184_v63, %v1950_v40  ;;  %v2186_v2 = vpop.f32.mrb[13].mxu0 }
 0x38f   : > { %v2187_v53 = vadd.f32 %v2186_v2, %v1950_v40 }
 0x390   : > { %v2276_v47 = vmax.f32 %v2185_v23, 0.0 }
 0x391   : > { %v2277_v42 = vmax.f32 %v2187_v53, 0.0  ;;  %v2190_v62 = vpop.f32.mrb[14].mxu0  ;;  %v2261_v56 = vpop.f32.mrb[12].mxu1 }
 0x392   : > { %2292 = vst [vmem:[%s4594_s8 + $0x20] sm:$0xff] %v2276_v47  ;;  %v2191_v38 = vadd.f32 %v2190_v62, %v1955_v48  ;;  %v2262_v50 = vadd.f32 %v2261_v56, %v1950_v40  ;;  %v2192_v55 = vpop.f32.mrb[15].mxu0  ;;  %v2263_v17 = vpop.f32.mrb[13].mxu1 }
 0x393   : > { %2293 = vst [vmem:[%s4594_s8 + $0x28] sm:$0xff] %v2277_v42  ;;  %v2193_v52 = vadd.f32 %v2192_v55, %v1955_v48  ;;  %v2264_v60 = vadd.f32 %v2263_v17, %v1950_v40 }
 0x394   : > { %v2284_v7 = vmax.f32 %v2191_v38, 0.0  ;;  %v2278_v28 = vmax.f32 %v2262_v50, 0.0 }
 0x395   : > { %v2285_v20 = vmax.f32 %v2193_v52, 0.0  ;;  %v2279_v16 = vmax.f32 %v2264_v60, 0.0  ;;  %v2267_v46 = vpop.f32.mrb[14].mxu1 }
 0x396   : > { %2300 = vst [vmem:[%s4594_s8 + $0x60] sm:$0xff] %v2284_v7  ;;  %2294 = vst [vmem:[%s4594_s8 + $0x30] sm:$0xff] %v2278_v28  ;;  %v2268_v9 = vadd.f32 %v2267_v46, %v1955_v48  ;;  %v2269_v22 = vpop.f32.mrb[15].mxu1 }
 0x397   : > { %2301 = vst [vmem:[%s4594_s8 + $0x68] sm:$0xff] %v2285_v20  ;;  %2295 = vst [vmem:[%s4594_s8 + $0x38] sm:$0xff] %v2279_v16  ;;  %v2270_v10 = vadd.f32 %v2269_v22, %v1955_v48 }
 0x398   : > { %v2286_v36 = vmax.f32 %v2268_v9, 0.0 }
 0x399   : > { %v2287_v18 = vmax.f32 %v2270_v10, 0.0 }
 0x39a   : > { %2302 = vst [vmem:[%s4594_s8 + $0x70] sm:$0xff] %v2286_v36 }
 0x39b   : > { %2303 = vst [vmem:[%s4594_s8 + $0x78] sm:$0xff] %v2287_v18 }
 0x39c   : > { %2702 = shalt.err (!%p2699_p11)
}
 0x39d   : > { %s2703_s20 = scalar_lea.hbm %s4615_s16, 2048  ;;  %s2707_s23 = scalar_lea.hbm %s4671_s7, 4096 }
 0x39e   : > { %p2704_p13 = scmp.ne.s32.totalorder %s4615_s16, %s2703_s20  ;;  %p2708_p6 = scmp.lt.u32.totalorder %s4615_s16, %s4671_s7 }
 0x39f   : > { %p2709_p9 = scmp.lt.u32.totalorder %s2707_s23, %s2703_s20  ;;  %p2711_p10 = scmp.lt.u32.totalorder %s2703_s20, %s4615_s16 }
 0x3a0   : > { %p2705_p5 = pnand %p2704_p13, %p5066_p1 }
 0x3a1   : > { %p2710_p12 = por %p2709_p9, %p2708_p6 }
 0x3a2   : > { %p2706_p0 = pneg %p2705_p5 }
 0x3a3   : > { %p2712_p2 = por %p2711_p10, %p2710_p12 }
 0x3a5   : > { %p2713_p3 = pnand %p2712_p2, %p2706_p0 }
 0x3a7   : > { %2716 = shalt.err (!%p2713_p3)
}
 0x3a8   : > { %s2776_s9 = smov 1024   ;;  %s2777_s10 = smov 64  }
 0x3a9   : > { %2565 = dma.vmem_to_hbm [thread:$0]  (%p5066_p1), %s4617_s15, 2048, %s4615_s16, %s4623_s28, %s2776_s9, %s2776_s9, %s2777_s10  }
 0x3aa PF: > { %p2582_p4 = scmp.ge.s32.totalorder %s2759_s27, 2  ;;  %s2333_s19 = sand.u32 1, %s2747_s24  }
 0x3ab   : > { %p5067_p7 = scmp.ne.s32.totalorder %s4807_s12, 0  ;;  %s2334_s13 = scalar_lea.sflag [#allocation4], %s2333_s19 }
 0x3ad   : > { %p2575_p8 = pnand %p2582_p4, %p5067_p7 }
 0x3af   : > { %2742 = dma.done.wait (!%p2575_p8), %s2334_s13, 2048  }
 0x3b0   : > { %2744 = vsyncadd (!%p2575_p8), %s2334_s13, 4294965248  ;;  %s5068_s18 = sld [smem:[#allocation11_spill]]  ;;  %p19_p11 = scmp.ge.s32.totalorder %s2843_s30, 4  }
 0x3b1   : > { %s5069_s24 = smov %s2751_s25  ;;  %s5070_s25 = smov %s2755_s26 }
 0x3b2   : > { %s5072_s27 = smov %s2843_s30  ;;  %21 = sbr.rel (!%p19_p11) target bundleno = 5 (0x5), region = 104 }
 0x3b6   : > { %s5071_s26 = smov %s5068_s18 }
 0x3b9   :  { %2339 = vsyncpa [#allocation3], 1 }
 0x3ba   :  { %2341 = vsyncpa [#allocation3 + $0x1], 1 }
 0x3bb   :  { %2342 = vsyncpa [#allocation6], 1 }
 0x3bc   :  { %2343 = vsyncpa [#allocation4], 1 }
 0x3bd   :  { %2345 = vsyncpa [#allocation4 + $0x1], 1 }

</bundles_post_ra>
